<compile_context>
chip_gen: v5e
topology: v5e:2x2
jax: 0.10.0
libtpu: 0.0.40
codegen_flags: <defaults>
</compile_context>

<pallas_src>
import functools

import jax
import jax.numpy as jnp
from jax.experimental import pallas as pl
from jax.experimental.pallas import tpu as pltpu

D_IN, D_H1, D_H2, D_OUT = 784, 400, 200, 20
D_HEAD_PAD = 128  # fused mean|logvar head, padded to one full lane tile


def encoder_kernel(x_ref, w1_ref, b1_ref, w2_ref, b2_ref, wh_ref, bh_ref,
                   out_ref):
    # In-kernel activation cast (VPU, hidden under the MXU). Keeps the x DMA
    # stream in its native dtype and avoids an extra wrapper-side HBM pass.
    x = x_ref[...].astype(w1_ref.dtype)
    # layer1 + ReLU (f32 MXU accumulation; bias/ReLU in f32 on the VPU)
    h1 = jnp.dot(x, w1_ref[...], preferred_element_type=jnp.float32)
    h1 = jnp.maximum(h1 + b1_ref[...], 0.0)
    # layer2 + ReLU
    h2 = jnp.dot(h1.astype(w2_ref.dtype), w2_ref[...],
                 preferred_element_type=jnp.float32)
    h2 = jnp.maximum(h2 + b2_ref[...], 0.0)
    # fused, lane-padded mean|logvar head: one (TM, 128) matmul + unmasked store
    out = jnp.dot(h2.astype(wh_ref.dtype), wh_ref[...],
                  preferred_element_type=jnp.float32)
    out_ref[...] = (out + bh_ref[...]).astype(out_ref.dtype)


def _round_up(n, m):
    return (n + m - 1) // m * m


def _cdiv(a, b):
    return -(-a // b)


def _choose_tm(batch, block_m):
    """Balance the batch across grid steps (minimizes padded rows) and give
    large batches >= 2 grid steps so v7x's second TensorCore gets work."""
    steps = _cdiv(batch, block_m)
    if batch >= 512:
        steps = max(steps, 2)
    return _round_up(_cdiv(batch, steps), 8)


def _vmem_limit_bytes(tm, w_itemsize, x_itemsize):
    """Scoped-VMEM request sized to the actual buffers (double-buffered
    activation/output tiles + resident weights + in-kernel temporaries)."""
    lane = lambda n: _round_up(n, 128)
    est = (2 * tm * lane(D_IN) * x_itemsize                     # x tiles
           + 2 * tm * D_HEAD_PAD * 4                            # out tiles
           + 2 * w_itemsize * (D_IN * lane(D_H1)                # weights (x2 bufs)
                               + D_H1 * lane(D_H2)
                               + D_H2 * D_HEAD_PAD)
           + tm * (lane(D_IN) * w_itemsize                      # cast-x temp
                   + (lane(D_H1) + lane(D_H2)) * 4)             # h1/h2 f32 temps
           + (1 << 20))                                         # biases + slack
    # Clamp: >= 24 MiB (above v5e's 16 MiB scoped default), <= 48 MiB
    # (under v7x's 64 MiB physical VMEM per TensorCore).
    return min(48 << 20, max(24 << 20, int(est * 1.25)))


@functools.partial(jax.jit, static_argnames=("block_m",))
def encoder_forward(x, kp, *, block_m=1024):
    """x: (B, 784). kp: prepared params (see prepare_params). Returns (mean, logvar)."""
    B = x.shape[0]
    w_dtype = kp["w1"].dtype

    tm = _choose_tm(B, block_m)
    b_pad = _round_up(B, tm)
    if b_pad != B:
        x = jnp.pad(x, ((0, b_pad - B), (0, 0)))

    const = lambda a: pl.BlockSpec(a.shape, lambda i: (0,) * a.ndim)

    flops = 2 * b_pad * (D_IN * D_H1 + D_H1 * D_H2 + D_H2 * 2 * D_OUT)
    w_bytes = sum(int(a.size) * a.dtype.itemsize for a in
                  (kp["w1"], kp["b1"], kp["w2"], kp["b2"], kp["wh"], kp["bh"]))
    bytes_accessed = (b_pad * D_IN * x.dtype.itemsize + w_bytes
                      + b_pad * D_HEAD_PAD * 4)

    out = pl.pallas_call(
        encoder_kernel,
        out_shape=jax.ShapeDtypeStruct((b_pad, D_HEAD_PAD), jnp.float32),
        grid=(b_pad // tm,),
        in_specs=[
            pl.BlockSpec((tm, D_IN), lambda i: (i, 0)),   # activations: tiled
            const(kp["w1"]), const(kp["b1"]),             # weights: VMEM-resident
            const(kp["w2"]), const(kp["b2"]),
            const(kp["wh"]), const(kp["bh"]),
        ],
        out_specs=pl.BlockSpec((tm, D_HEAD_PAD), lambda i: (i, 0)),
        compiler_params=pltpu.CompilerParams(
            dimension_semantics=("parallel",),
            vmem_limit_bytes=_vmem_limit_bytes(
                tm, jnp.dtype(w_dtype).itemsize, x.dtype.itemsize)),
        cost_estimate=pl.CostEstimate(flops=flops, transcendentals=0,
                                      bytes_accessed=bytes_accessed),
    )(x, kp["w1"], kp["b1"], kp["w2"], kp["b2"], kp["wh"], kp["bh"])

    out = out[:B]
    return out[:, :D_OUT], out[:, D_OUT:2 * D_OUT]


def init_params(key):
    """PyTorch-style init; weights stored transposed as (in, out)."""
    ks = jax.random.split(key, 8)

    def linear(kw, kb, fan_in, fan_out):
        bound = 1.0 / jnp.sqrt(float(fan_in))
        w = jax.random.uniform(kw, (fan_in, fan_out), jnp.float32, -bound, bound)
        b = jax.random.uniform(kb, (1, fan_out), jnp.float32, -bound, bound)
        return w, b

    w1, b1 = linear(ks[0], ks[1], D_IN, D_H1)
    w2, b2 = linear(ks[2], ks[3], D_H1, D_H2)
    wm, bm = linear(ks[4], ks[5], D_H2, D_OUT)
    wl, bl = linear(ks[6], ks[7], D_H2, D_OUT)
    return dict(w1=w1, b1=b1, w2=w2, b2=b2, wm=wm, bm=bm, wl=wl, bl=bl)


def prepare_params(p, compute_dtype=jnp.bfloat16):
    """One-time prep: fuse mean/logvar heads, pad the head to a full 128-lane
    tile (lane-dense store), and cast weights to the MXU compute dtype.
    Biases stay f32 (added after f32 accumulation)."""
    wh = jnp.concatenate([p["wm"], p["wl"]], axis=1)            # (200, 40)
    bh = jnp.concatenate([p["bm"], p["bl"]], axis=1)            # (1, 40)
    wh = jnp.pad(wh, ((0, 0), (0, D_HEAD_PAD - 2 * D_OUT)))     # (200, 128)
    bh = jnp.pad(bh, ((0, 0), (0, D_HEAD_PAD - 2 * D_OUT)))     # (1, 128)
    cast = lambda a: a.astype(compute_dtype)
    return dict(
        w1=cast(p["w1"]), b1=p["b1"].astype(jnp.float32),
        w2=cast(p["w2"]), b2=p["b2"].astype(jnp.float32),
        wh=cast(wh), bh=bh.astype(jnp.float32),
    )


def encoder_ref(x, p):
    h1 = jnp.maximum(x @ p["w1"] + p["b1"], 0.0)
    h2 = jnp.maximum(h1 @ p["w2"] + p["b2"], 0.0)
    return h2 @ p["wm"] + p["bm"], h2 @ p["wl"] + p["bl"]


if __name__ == "__main__":
    key = jax.random.PRNGKey(0)
    k_x, k_p = jax.random.split(key)

    params = init_params(k_p)

    # --- f32 path (tight tolerance) ----------------------------------------
    B = 8
    x = jax.random.normal(k_x, (B, D_IN), jnp.float32)
    kp32 = prepare_params(params, jnp.float32)

    mean, logvar = encoder_forward(x, kp32)
    jax.block_until_ready((mean, logvar))

    mean_r, logvar_r = encoder_ref(x, params)
    assert mean.shape == (B, D_OUT) and logvar.shape == (B, D_OUT)
    assert jnp.allclose(mean, mean_r, atol=1e-4, rtol=1e-4)
    assert jnp.allclose(logvar, logvar_r, atol=1e-4, rtol=1e-4)

    # --- ragged batch (exercises padding / tile-balancing path) -------------
    B2 = 13
    x2 = jax.random.normal(k_x, (B2, D_IN), jnp.float32)
    m2, lv2 = encoder_forward(x2, kp32)
    jax.block_until_ready((m2, lv2))
    m2_r, lv2_r = encoder_ref(x2, params)
    assert jnp.allclose(m2, m2_r, atol=1e-4, rtol=1e-4)
    assert jnp.allclose(lv2, lv2_r, atol=1e-4, rtol=1e-4)

    # --- default bf16 fast path: f32 accumulation, looser tolerance ---------
    kpbf = prepare_params(params)                     # bf16 weights by default
    m_bf, lv_bf = encoder_forward(x, kpbf)
    jax.block_until_ready((m_bf, lv_bf))
    assert jnp.allclose(m_bf, mean_r, atol=5e-2, rtol=5e-2)
    assert jnp.allclose(lv_bf, logvar_r, atol=5e-2, rtol=5e-2)

    print("KERNEL_OK")
</pallas_src>

<mosaic_0001>
module attributes {stable_mosaic.version = 11 : i64} {
  func.func @encoder_kernel(%arg0: i32, %arg1: memref<8x784xf32, #tpu.memory_space<vmem>>, %arg2: memref<784x400xf32, #tpu.memory_space<vmem>>, %arg3: memref<1x400xf32, #tpu.memory_space<vmem>>, %arg4: memref<400x200xf32, #tpu.memory_space<vmem>>, %arg5: memref<1x200xf32, #tpu.memory_space<vmem>>, %arg6: memref<200x128xf32, #tpu.memory_space<vmem>>, %arg7: memref<1x128xf32, #tpu.memory_space<vmem>>, %arg8: memref<8x128xf32, #tpu.memory_space<vmem>>) attributes {dimension_semantics = [#tpu.dimension_semantics<parallel>], iteration_bounds = array<i64: 1>, scalar_prefetch = 0 : i64, scratch_operands = 0 : i64, tpu.core_type = #tpu.core_type<tc>, window_params = [{transform_indices = @transform_0, window_bounds = array<i64: 8, 784>}, {pipeline_mode = #tpu.pipeline_mode<synchronous>, transform_indices = @transform_1, window_bounds = array<i64: 784, 400>}, {pipeline_mode = #tpu.pipeline_mode<synchronous>, transform_indices = @transform_2, window_bounds = array<i64: 1, 400>}, {pipeline_mode = #tpu.pipeline_mode<synchronous>, transform_indices = @transform_3, window_bounds = array<i64: 400, 200>}, {pipeline_mode = #tpu.pipeline_mode<synchronous>, transform_indices = @transform_4, window_bounds = array<i64: 1, 200>}, {pipeline_mode = #tpu.pipeline_mode<synchronous>, transform_indices = @transform_5, window_bounds = array<i64: 200, 128>}, {pipeline_mode = #tpu.pipeline_mode<synchronous>, transform_indices = @transform_6, window_bounds = array<i64: 1, 128>}, {transform_indices = @transform_7, window_bounds = array<i64: 8, 128>}]} {
    %c0 = arith.constant 0 : index
    %c0_0 = arith.constant 0 : index
    %0 = vector.load %arg1[%c0, %c0_0] : memref<8x784xf32, #tpu.memory_space<vmem>>, vector<8x784xf32>
    %c0_1 = arith.constant 0 : index
    %c0_2 = arith.constant 0 : index
    %1 = vector.load %arg2[%c0_1, %c0_2] : memref<784x400xf32, #tpu.memory_space<vmem>>, vector<784x400xf32>
    %cst = arith.constant dense<0.000000e+00> : vector<8x400xf32>
    %2 = tpu.matmul %0, %1, %cst {dimension_numbers = #tpu.dot_dimension_numbers<[1], [0], [0], [1], [0, 0, 1, 1], [], []>} : vector<8x784xf32>, vector<784x400xf32>, vector<8x400xf32> -> vector<8x400xf32>
    %c0_3 = arith.constant 0 : index
    %c0_4 = arith.constant 0 : index
    %3 = vector.load %arg3[%c0_3, %c0_4] : memref<1x400xf32, #tpu.memory_space<vmem>>, vector<1x400xf32>
    %4 = vector.broadcast %3 : vector<1x400xf32> to vector<8x400xf32>
    %5 = arith.addf %2, %4 : vector<8x400xf32>
    %cst_5 = arith.constant 0.000000e+00 : f32
    %6 = vector.broadcast %cst_5 : f32 to vector<8x400xf32>
    %7 = arith.maximumf %5, %6 : vector<8x400xf32>
    %c0_6 = arith.constant 0 : index
    %c0_7 = arith.constant 0 : index
    %8 = vector.load %arg4[%c0_6, %c0_7] : memref<400x200xf32, #tpu.memory_space<vmem>>, vector<400x200xf32>
    %cst_8 = arith.constant dense<0.000000e+00> : vector<8x200xf32>
    %9 = tpu.matmul %7, %8, %cst_8 {dimension_numbers = #tpu.dot_dimension_numbers<[1], [0], [0], [1], [0, 0, 1, 1], [], []>} : vector<8x400xf32>, vector<400x200xf32>, vector<8x200xf32> -> vector<8x200xf32>
    %c0_9 = arith.constant 0 : index
    %c0_10 = arith.constant 0 : index
    %10 = vector.load %arg5[%c0_9, %c0_10] : memref<1x200xf32, #tpu.memory_space<vmem>>, vector<1x200xf32>
    %11 = vector.broadcast %10 : vector<1x200xf32> to vector<8x200xf32>
    %12 = arith.addf %9, %11 : vector<8x200xf32>
    %cst_11 = arith.constant 0.000000e+00 : f32
    %13 = vector.broadcast %cst_11 : f32 to vector<8x200xf32>
    %14 = arith.maximumf %12, %13 : vector<8x200xf32>
    %c0_12 = arith.constant 0 : index
    %c0_13 = arith.constant 0 : index
    %15 = vector.load %arg6[%c0_12, %c0_13] : memref<200x128xf32, #tpu.memory_space<vmem>>, vector<200x128xf32>
    %cst_14 = arith.constant dense<0.000000e+00> : vector<8x128xf32>
    %16 = tpu.matmul %14, %15, %cst_14 {dimension_numbers = #tpu.dot_dimension_numbers<[1], [0], [0], [1], [0, 0, 1, 1], [], []>} : vector<8x200xf32>, vector<200x128xf32>, vector<8x128xf32> -> vector<8x128xf32>
    %c0_15 = arith.constant 0 : index
    %c0_16 = arith.constant 0 : index
    %17 = vector.load %arg7[%c0_15, %c0_16] : memref<1x128xf32, #tpu.memory_space<vmem>>, vector<1x128xf32>
    %18 = vector.broadcast %17 : vector<1x128xf32> to vector<8x128xf32>
    %19 = arith.addf %16, %18 : vector<8x128xf32>
    %c0_17 = arith.constant 0 : index
    %c0_18 = arith.constant 0 : index
    %20 = vector.load %arg8[%c0_17, %c0_18] : memref<8x128xf32, #tpu.memory_space<vmem>>, vector<8x128xf32>
    tpu.vector_store %arg8[%c0_17, %c0_18], %19 {strides = array<i32>} : memref<8x128xf32, #tpu.memory_space<vmem>>, vector<8x128xf32>,
    return
  }
  func.func @transform_0(%arg0: i32) -> (i32, i32) {
    %c0_i32 = arith.constant 0 : i32
    %c0_i32_0 = arith.constant 0 : i32
    return %arg0, %c0_i32 : i32, i32
  }
  func.func @transform_1(%arg0: i32) -> (i32, i32) {
    %c0_i32 = arith.constant 0 : i32
    %c0_i32_0 = arith.constant 0 : i32
    %c0_i32_1 = arith.constant 0 : i32
    return %c0_i32, %c0_i32_0 : i32, i32
  }
  func.func @transform_2(%arg0: i32) -> (i32, i32) {
    %c0_i32 = arith.constant 0 : i32
    %c0_i32_0 = arith.constant 0 : i32
    %c0_i32_1 = arith.constant 0 : i32
    return %c0_i32, %c0_i32_0 : i32, i32
  }
  func.func @transform_3(%arg0: i32) -> (i32, i32) {
    %c0_i32 = arith.constant 0 : i32
    %c0_i32_0 = arith.constant 0 : i32
    %c0_i32_1 = arith.constant 0 : i32
    return %c0_i32, %c0_i32_0 : i32, i32
  }
  func.func @transform_4(%arg0: i32) -> (i32, i32) {
    %c0_i32 = arith.constant 0 : i32
    %c0_i32_0 = arith.constant 0 : i32
    %c0_i32_1 = arith.constant 0 : i32
    return %c0_i32, %c0_i32_0 : i32, i32
  }
  func.func @transform_5(%arg0: i32) -> (i32, i32) {
    %c0_i32 = arith.constant 0 : i32
    %c0_i32_0 = arith.constant 0 : i32
    %c0_i32_1 = arith.constant 0 : i32
    return %c0_i32, %c0_i32_0 : i32, i32
  }
  func.func @transform_6(%arg0: i32) -> (i32, i32) {
    %c0_i32 = arith.constant 0 : i32
    %c0_i32_0 = arith.constant 0 : i32
    %c0_i32_1 = arith.constant 0 : i32
    return %c0_i32, %c0_i32_0 : i32, i32
  }
  func.func @transform_7(%arg0: i32) -> (i32, i32) {
    %c0_i32 = arith.constant 0 : i32
    %c0_i32_0 = arith.constant 0 : i32
    return %arg0, %c0_i32 : i32, i32
  }
}

</mosaic_0001>

<bundles_post_ra>
// kernel: encoder_forward.1
= control target key start
LH: loop header
LB: loop body
LE: loop exit
PB: predicated region body
PF: predicated region fallthrough
CT: control target
= control target key end

     0   :  { %vm435_vm0 = vcmask 130048   ;;  %vm1303_vm1 = vcmask 588800   ;;  %s3073_s1 = inlined_call_operand.vmem [shape: f32[784,400], index: 1, kind: input, shape index: {}]   ;;  %s3074_s0 = inlined_call_operand.vmem [shape: f32[8,784], index: 0, kind: input, shape index: {}]   ;;  %s3075_s2 = inlined_call_operand.vmem [shape: f32[1,400], index: 2, kind: input, shape index: {}]   ;;  %s3076_s3 = inlined_call_operand.vmem [shape: f32[400,200], index: 3, kind: input, shape index: {}]   ;;  %s3077_s6 = inlined_call_operand.vmem [shape: f32[1,128], index: 6, kind: input, shape index: {}]   ;;  %s3078_s5 = inlined_call_operand.vmem [shape: f32[200,128], index: 5, kind: input, shape index: {}]   ;;  %s3079_s4 = inlined_call_operand.vmem [shape: f32[1,200], index: 4, kind: input, shape index: {}]   ;;  %s3080_s7 = inlined_call_operand.vmem [shape: f32[8,128], index: 7, kind: output, shape index: {}]  }
   0x1   :  { %v93_v0 = vld [vmem:[%s3073_s1 + $0x1e0] sm:$0xff] }
   0x2   :  { %v157_v1 = vld [vmem:[%s3073_s1 + $0x3e0] sm:$0xff]  ;;  %439 = vmatpush.msra.mxu0 %v93_v0 }
   0x3   :  { %v285_v2 = vld [vmem:[%s3073_s1 + $0x7e0] sm:$0xff]  ;;  %459 = vmatpush.msra.mxu1 %v157_v1 }
   0x4   :  { %v221_v3 = vld [vmem:[%s3073_s1 + $0x5e0] sm:$0xff]  ;;  %499 = vmatpush.msra.mxu3 %v285_v2 }
   0x5   :  { %v89_v4 = vld [vmem:[%s3073_s1 + $0x1c0] sm:$0xff]  ;;  %479 = vmatpush.msra.mxu2 %v221_v3  ;;  %v1611_v3 = vld [vmem:[%s3074_s0 + $0x10] sm:$0xff] }
   0x6   :  { %v153_v5 = vld [vmem:[%s3073_s1 + $0x3c0] sm:$0xff]  ;;  %440 = vmatpush.msra.mxu0 %v89_v4 }
   0x7   :  { %v281_v6 = vld [vmem:[%s3073_s1 + $0x7c0] sm:$0xff]  ;;  %460 = vmatpush.msra.mxu1 %v153_v5 }
   0x8   :  { %v217_v7 = vld [vmem:[%s3073_s1 + $0x5c0] sm:$0xff]  ;;  %500 = vmatpush.msra.mxu3 %v281_v6 }
   0x9   :  { %v85_v8 = vld [vmem:[%s3073_s1 + $0x1a0] sm:$0xff]  ;;  %480 = vmatpush.msra.mxu2 %v217_v7 }
   0xa   :  { %v149_v9 = vld [vmem:[%s3073_s1 + $0x3a0] sm:$0xff]  ;;  %441 = vmatpush.msra.mxu0 %v85_v8  ;;  %v1631_v8 = vld [vmem:[%s3074_s0 + $0x18] sm:$0xff] }
   0xb   :  { %v277_v10 = vld [vmem:[%s3073_s1 + $0x7a0] sm:$0xff]  ;;  %461 = vmatpush.msra.mxu1 %v149_v9 }
   0xc   :  { %v213_v11 = vld [vmem:[%s3073_s1 + $0x5a0] sm:$0xff]  ;;  %501 = vmatpush.msra.mxu3 %v277_v10  ;;  %v94_v10 = vld [vmem:[%s3073_s1 + $0x1e8] sm:$0xff] }
   0xd   :  { %v81_v12 = vld [vmem:[%s3073_s1 + $0x180] sm:$0xff]  ;;  %481 = vmatpush.msra.mxu2 %v213_v11 }
   0xe   :  { %v145_v13 = vld [vmem:[%s3073_s1 + $0x380] sm:$0xff]  ;;  %442 = vmatpush.msra.mxu0 %v81_v12  ;;  %v1646_v12 = vld [vmem:[%s3074_s0 + $0x8] sm:$0xff] }
   0xf   :  { %v273_v14 = vld [vmem:[%s3073_s1 + $0x780] sm:$0xff]  ;;  %462 = vmatpush.msra.mxu1 %v145_v13  ;;  %v158_v13 = vld [vmem:[%s3073_s1 + $0x3e8] sm:$0xff] }
  0x10   :  { %v209_v15 = vld [vmem:[%s3073_s1 + $0x580] sm:$0xff]  ;;  %502 = vmatpush.msra.mxu3 %v273_v14  ;;  %v90_v14 = vld [vmem:[%s3073_s1 + $0x1c8] sm:$0xff] }
  0x11   :  { %v77_v16 = vld [vmem:[%s3073_s1 + $0x160] sm:$0xff]  ;;  %482 = vmatpush.msra.mxu2 %v209_v15 }
  0x12   :  { %v141_v17 = vld [vmem:[%s3073_s1 + $0x360] sm:$0xff]  ;;  %443 = vmatpush.msra.mxu0 %v77_v16 }
  0x13   :  { %v269_v18 = vld [vmem:[%s3073_s1 + $0x760] sm:$0xff]  ;;  %463 = vmatpush.msra.mxu1 %v141_v17  ;;  %v154_v17 = vld [vmem:[%s3073_s1 + $0x3c8] sm:$0xff] }
  0x14   :  { %v205_v19 = vld [vmem:[%s3073_s1 + $0x560] sm:$0xff]  ;;  %503 = vmatpush.msra.mxu3 %v269_v18  ;;  %v86_v18 = vld [vmem:[%s3073_s1 + $0x1a8] sm:$0xff] }
  0x15   :  { %v73_v20 = vld [vmem:[%s3073_s1 + $0x140] sm:$0xff]  ;;  %483 = vmatpush.msra.mxu2 %v205_v19 }
  0x16   :  { %v137_v21 = vld [vmem:[%s3073_s1 + $0x340] sm:$0xff]  ;;  %444 = vmatpush.msra.mxu0 %v73_v20 }
  0x17   :  { %v265_v22 = vld [vmem:[%s3073_s1 + $0x740] sm:$0xff]  ;;  %464 = vmatpush.msra.mxu1 %v137_v21  ;;  %v150_v21 = vld [vmem:[%s3073_s1 + $0x3a8] sm:$0xff] }
  0x18   :  { %v201_v23 = vld [vmem:[%s3073_s1 + $0x540] sm:$0xff]  ;;  %504 = vmatpush.msra.mxu3 %v265_v22  ;;  %v82_v22 = vld [vmem:[%s3073_s1 + $0x188] sm:$0xff] }
  0x19   :  { %v69_v24 = vld [vmem:[%s3073_s1 + $0x120] sm:$0xff]  ;;  %484 = vmatpush.msra.mxu2 %v201_v23 }
  0x1a   :  { %v133_v25 = vld [vmem:[%s3073_s1 + $0x320] sm:$0xff]  ;;  %445 = vmatpush.msra.mxu0 %v69_v24 }
  0x1b   :  { %v261_v26 = vld [vmem:[%s3073_s1 + $0x720] sm:$0xff]  ;;  %465 = vmatpush.msra.mxu1 %v133_v25  ;;  %v146_v25 = vld [vmem:[%s3073_s1 + $0x388] sm:$0xff] }
  0x1c   :  { %v197_v27 = vld [vmem:[%s3073_s1 + $0x520] sm:$0xff]  ;;  %505 = vmatpush.msra.mxu3 %v261_v26  ;;  %v78_v26 = vld [vmem:[%s3073_s1 + $0x168] sm:$0xff] }
  0x1d   :  { %v65_v28 = vld [vmem:[%s3073_s1 + $0x100] sm:$0xff]  ;;  %485 = vmatpush.msra.mxu2 %v197_v27 }
  0x1e   :  { %v129_v29 = vld [vmem:[%s3073_s1 + $0x300] sm:$0xff]  ;;  %446 = vmatpush.msra.mxu0 %v65_v28 }
  0x1f   :  { %v257_v30 = vld [vmem:[%s3073_s1 + $0x700] sm:$0xff]  ;;  %466 = vmatpush.msra.mxu1 %v129_v29  ;;  %v142_v29 = vld [vmem:[%s3073_s1 + $0x368] sm:$0xff] }
  0x20   :  { %v193_v31 = vld [vmem:[%s3073_s1 + $0x500] sm:$0xff]  ;;  %506 = vmatpush.msra.mxu3 %v257_v30  ;;  %v74_v30 = vld [vmem:[%s3073_s1 + $0x148] sm:$0xff] }
  0x21   :  { %v61_v32 = vld [vmem:[%s3073_s1 + $0xe0] sm:$0xff]  ;;  %486 = vmatpush.msra.mxu2 %v193_v31 }
  0x22   :  { %v125_v33 = vld [vmem:[%s3073_s1 + $0x2e0] sm:$0xff]  ;;  %447 = vmatpush.msra.mxu0 %v61_v32 }
  0x23   :  { %v253_v34 = vld [vmem:[%s3073_s1 + $0x6e0] sm:$0xff]  ;;  %467 = vmatpush.msra.mxu1 %v125_v33  ;;  %v138_v33 = vld [vmem:[%s3073_s1 + $0x348] sm:$0xff] }
  0x24   :  { %v189_v35 = vld [vmem:[%s3073_s1 + $0x4e0] sm:$0xff]  ;;  %507 = vmatpush.msra.mxu3 %v253_v34  ;;  %v70_v34 = vld [vmem:[%s3073_s1 + $0x128] sm:$0xff] }
  0x25   :  { %v57_v36 = vld [vmem:[%s3073_s1 + $0xc0] sm:$0xff]  ;;  %487 = vmatpush.msra.mxu2 %v189_v35 }
  0x26   :  { %v121_v37 = vld [vmem:[%s3073_s1 + $0x2c0] sm:$0xff]  ;;  %448 = vmatpush.msra.mxu0 %v57_v36 }
  0x27   :  { %v249_v38 = vld [vmem:[%s3073_s1 + $0x6c0] sm:$0xff]  ;;  %468 = vmatpush.msra.mxu1 %v121_v37  ;;  %v134_v37 = vld [vmem:[%s3073_s1 + $0x328] sm:$0xff] }
  0x28   :  { %v185_v39 = vld [vmem:[%s3073_s1 + $0x4c0] sm:$0xff]  ;;  %508 = vmatpush.msra.mxu3 %v249_v38  ;;  %v66_v38 = vld [vmem:[%s3073_s1 + $0x108] sm:$0xff] }
  0x29   :  { %v53_v40 = vld [vmem:[%s3073_s1 + $0xa0] sm:$0xff]  ;;  %488 = vmatpush.msra.mxu2 %v185_v39 }
  0x2a   :  { %v117_v41 = vld [vmem:[%s3073_s1 + $0x2a0] sm:$0xff]  ;;  %449 = vmatpush.msra.mxu0 %v53_v40 }
  0x2b   :  { %v245_v42 = vld [vmem:[%s3073_s1 + $0x6a0] sm:$0xff]  ;;  %469 = vmatpush.msra.mxu1 %v117_v41  ;;  %v130_v41 = vld [vmem:[%s3073_s1 + $0x308] sm:$0xff] }
  0x2c   :  { %v181_v43 = vld [vmem:[%s3073_s1 + $0x4a0] sm:$0xff]  ;;  %509 = vmatpush.msra.mxu3 %v245_v42  ;;  %v62_v42 = vld [vmem:[%s3073_s1 + $0xe8] sm:$0xff] }
  0x2d   :  { %v49_v44 = vld [vmem:[%s3073_s1 + $0x80] sm:$0xff]  ;;  %489 = vmatpush.msra.mxu2 %v181_v43 }
  0x2e   :  { %v113_v45 = vld [vmem:[%s3073_s1 + $0x280] sm:$0xff]  ;;  %450 = vmatpush.msra.mxu0 %v49_v44 }
  0x2f   :  { %v241_v46 = vld [vmem:[%s3073_s1 + $0x680] sm:$0xff]  ;;  %470 = vmatpush.msra.mxu1 %v113_v45  ;;  %v126_v45 = vld [vmem:[%s3073_s1 + $0x2e8] sm:$0xff] }
  0x30   :  { %v177_v47 = vld [vmem:[%s3073_s1 + $0x480] sm:$0xff]  ;;  %510 = vmatpush.msra.mxu3 %v241_v46  ;;  %v58_v46 = vld [vmem:[%s3073_s1 + $0xc8] sm:$0xff] }
  0x31   :  { %v45_v48 = vld [vmem:[%s3073_s1 + $0x60] sm:$0xff]  ;;  %490 = vmatpush.msra.mxu2 %v177_v47 }
  0x32   :  { %v109_v49 = vld [vmem:[%s3073_s1 + $0x260] sm:$0xff]  ;;  %451 = vmatpush.msra.mxu0 %v45_v48 }
  0x33   :  { %v237_v50 = vld [vmem:[%s3073_s1 + $0x660] sm:$0xff]  ;;  %471 = vmatpush.msra.mxu1 %v109_v49  ;;  %v122_v49 = vld [vmem:[%s3073_s1 + $0x2c8] sm:$0xff] }
  0x34   :  { %v173_v51 = vld [vmem:[%s3073_s1 + $0x460] sm:$0xff]  ;;  %511 = vmatpush.msra.mxu3 %v237_v50  ;;  %v54_v50 = vld [vmem:[%s3073_s1 + $0xa8] sm:$0xff] }
  0x35   :  { %v41_v52 = vld [vmem:[%s3073_s1 + $0x40] sm:$0xff]  ;;  %491 = vmatpush.msra.mxu2 %v173_v51 }
  0x36   :  { %v105_v53 = vld [vmem:[%s3073_s1 + $0x240] sm:$0xff]  ;;  %452 = vmatpush.msra.mxu0 %v41_v52 }
  0x37   :  { %v233_v54 = vld [vmem:[%s3073_s1 + $0x640] sm:$0xff]  ;;  %472 = vmatpush.msra.mxu1 %v105_v53  ;;  %v118_v53 = vld [vmem:[%s3073_s1 + $0x2a8] sm:$0xff] }
  0x38   :  { %v169_v55 = vld [vmem:[%s3073_s1 + $0x440] sm:$0xff]  ;;  %512 = vmatpush.msra.mxu3 %v233_v54  ;;  %v50_v54 = vld [vmem:[%s3073_s1 + $0x88] sm:$0xff] }
  0x39   :  { %v37_v56 = vld [vmem:[%s3073_s1 + $0x20] sm:$0xff]  ;;  %492 = vmatpush.msra.mxu2 %v169_v55 }
  0x3a   :  { %v101_v57 = vld [vmem:[%s3073_s1 + $0x220] sm:$0xff]  ;;  %453 = vmatpush.msra.mxu0 %v37_v56 }
  0x3b   :  { %v229_v58 = vld [vmem:[%s3073_s1 + $0x620] sm:$0xff]  ;;  %473 = vmatpush.msra.mxu1 %v101_v57  ;;  %v114_v57 = vld [vmem:[%s3073_s1 + $0x288] sm:$0xff] }
  0x3c   :  { %v165_v59 = vld [vmem:[%s3073_s1 + $0x420] sm:$0xff]  ;;  %513 = vmatpush.msra.mxu3 %v229_v58  ;;  %v46_v58 = vld [vmem:[%s3073_s1 + $0x68] sm:$0xff] }
  0x3d   :  { %v33_v60 = vld [vmem:[%s3073_s1] sm:$0xff]  ;;  %493 = vmatpush.msra.mxu2 %v165_v59 }
  0x3e   :  { %v97_v61 = vld [vmem:[%s3073_s1 + $0x200] sm:$0xff]  ;;  %454 = vmatpush.msra.mxu0 %v33_v60 }
  0x3f   :  { %v225_v62 = vld [vmem:[%s3073_s1 + $0x600] sm:$0xff]  ;;  %474 = vmatpush.msra.mxu1 %v97_v61  ;;  %v1797_v61 = vld [vmem:[%s3074_s0 + $0x30] sm:$0xff] }
  0x40   :  { %v161_v63 = vld [vmem:[%s3073_s1 + $0x400] sm:$0xff]  ;;  %514 = vmatpush.msra.mxu3 %v225_v62  ;;  %475 = vmatmul.f32.vlgmr.msra.gmra.mxu1 %v1646_v12  ;;  %v42_v62 = vld [vmem:[%s3073_s1 + $0x48] sm:$0xff] }
  0x41   :  { %v349_v0 = vld [vmem:[%s3073_s1 + $0x9e0] sm:$0xff]  ;;  %494 = vmatpush.msra.mxu2 %v161_v63  ;;  %515 = vmatmul.f32.vlgmr.msra.gmra.mxu3 %v1631_v8  ;;  %v110_v63 = vld [vmem:[%s3073_s1 + $0x268] sm:$0xff] }
  0x42   :  { %v413_v1 = vld [vmem:[%s3073_s1 + $0xbe0] sm:$0xff]  ;;  %519 = vmatpush.msrb.mxu0 %v349_v0  ;;  %495 = vmatmul.f32.vlgmr.msra.gmra.mxu2 %v1611_v3 }
  0x43   :  { %v421_v2 = vld [vmem:[%s3073_s1 + $0xc20] sm:$0xff]  ;;  %539 = vmatpush.msrb.mxu1 %v413_v1  ;;  %599 = vmatpush.msrb.mxu2 %v158_v13  ;;  %v282_v13 = vld [vmem:[%s3073_s1 + $0x7c8] sm:$0xff] }
  0x44   :  { %v345_v4 = vld [vmem:[%s3073_s1 + $0x9c0] sm:$0xff]  ;;  %573 = vmatpush.msrb.mxu3 %v421_v2 }
  0x45   :  { %v409_v5 = vld [vmem:[%s3073_s1 + $0xbc0] sm:$0xff]  ;;  %520 = vmatpush.msrb.mxu0 %v345_v4  ;;  %600 = vmatpush.msrb.mxu2 %v154_v17  ;;  %v38_v4 = vld [vmem:[%s3073_s1 + $0x28] sm:$0xff] }
  0x46   :  { %v417_v6 = vld [vmem:[%s3073_s1 + $0xc00] sm:$0xff]  ;;  %540 = vmatpush.msrb.mxu1 %v409_v5  ;;  %v106_v5 = vld [vmem:[%s3073_s1 + $0x248] sm:$0xff] }
  0x47   :  { %v1625_v7 = vld [vmem:[%s3074_s0] sm:$0xff]  ;;  %574 = vmatpush.msrb.mxu3 %v417_v6  ;;  %601 = vmatpush.msrb.mxu2 %v150_v21  ;;  %v286_v6 = vld [vmem:[%s3073_s1 + $0x7e8] sm:$0xff] }
  0x48   :  { %v341_v9 = vld [vmem:[%s3073_s1 + $0x9a0] sm:$0xff]  ;;  %455 = vmatmul.f32.vlgmr.msra.gmra.mxu0 %v1625_v7  ;;  %v278_v17 = vld [vmem:[%s3073_s1 + $0x7a8] sm:$0xff] }
  0x49   :  { %v405_v11 = vld [vmem:[%s3073_s1 + $0xba0] sm:$0xff]  ;;  %521 = vmatpush.msrb.mxu0 %v341_v9  ;;  %579 = vmatpush.msra.mxu3 %v94_v10  ;;  %v1830_v9 = vld [vmem:[%s3074_s0 + $0x28] sm:$0xff] }
  0x4a   :  { %v337_v15 = vld [vmem:[%s3073_s1 + $0x980] sm:$0xff]  ;;  %541 = vmatpush.msrb.mxu1 %v405_v11  ;;  %602 = vmatpush.msrb.mxu2 %v146_v25  ;;  %v34_v10 = vld [vmem:[%s3073_s1 + $0x8] sm:$0xff] }
  0x4b   :  { %v401_v16 = vld [vmem:[%s3073_s1 + $0xb80] sm:$0xff]  ;;  %580 = vmatpush.msra.mxu3 %v90_v14  ;;  %522 = vmatpush.msrb.mxu0 %v337_v15  ;;  %v102_v11 = vld [vmem:[%s3073_s1 + $0x228] sm:$0xff] }
  0x4c   :  { %v333_v19 = vld [vmem:[%s3073_s1 + $0x960] sm:$0xff]  ;;  %542 = vmatpush.msrb.mxu1 %v401_v16  ;;  %603 = vmatpush.msrb.mxu2 %v142_v29  ;;  %v350_v14 = vld [vmem:[%s3073_s1 + $0x9e8] sm:$0xff] }
  0x4d   :  { %v397_v20 = vld [vmem:[%s3073_s1 + $0xb60] sm:$0xff]  ;;  %581 = vmatpush.msra.mxu3 %v86_v18  ;;  %523 = vmatpush.msrb.mxu0 %v333_v19  ;;  %v222_v15 = vld [vmem:[%s3073_s1 + $0x5e8] sm:$0xff] }
  0x4e   :  { %v329_v23 = vld [vmem:[%s3073_s1 + $0x940] sm:$0xff]  ;;  %543 = vmatpush.msrb.mxu1 %v397_v20  ;;  %604 = vmatpush.msrb.mxu2 %v138_v33  ;;  %v98_v16 = vld [vmem:[%s3073_s1 + $0x208] sm:$0xff] }
  0x4f   :  { %v393_v24 = vld [vmem:[%s3073_s1 + $0xb40] sm:$0xff]  ;;  %582 = vmatpush.msra.mxu3 %v82_v22  ;;  %524 = vmatpush.msrb.mxu0 %v329_v23  ;;  %v346_v18 = vld [vmem:[%s3073_s1 + $0x9c8] sm:$0xff] }
  0x50   :  { %v325_v27 = vld [vmem:[%s3073_s1 + $0x920] sm:$0xff]  ;;  %544 = vmatpush.msrb.mxu1 %v393_v24  ;;  %605 = vmatpush.msrb.mxu2 %v134_v37  ;;  %v414_v19 = vld [vmem:[%s3073_s1 + $0xbe8] sm:$0xff] }
  0x51   :  { %v389_v28 = vld [vmem:[%s3073_s1 + $0xb20] sm:$0xff]  ;;  %583 = vmatpush.msra.mxu3 %v78_v26  ;;  %525 = vmatpush.msrb.mxu0 %v325_v27  ;;  %v274_v20 = vld [vmem:[%s3073_s1 + $0x788] sm:$0xff] }
  0x52   :  { %v321_v31 = vld [vmem:[%s3073_s1 + $0x900] sm:$0xff]  ;;  %545 = vmatpush.msrb.mxu1 %v389_v28  ;;  %606 = vmatpush.msrb.mxu2 %v130_v41  ;;  %v218_v21 = vld [vmem:[%s3073_s1 + $0x5c8] sm:$0xff] }
  0x53   :  { %v385_v32 = vld [vmem:[%s3073_s1 + $0xb00] sm:$0xff]  ;;  %584 = vmatpush.msra.mxu3 %v74_v30  ;;  %526 = vmatpush.msrb.mxu0 %v321_v31  ;;  %v342_v22 = vld [vmem:[%s3073_s1 + $0x9a8] sm:$0xff] }
  0x54   :  { %v317_v35 = vld [vmem:[%s3073_s1 + $0x8e0] sm:$0xff]  ;;  %546 = vmatpush.msrb.mxu1 %v385_v32  ;;  %607 = vmatpush.msrb.mxu2 %v126_v45  ;;  %v410_v23 = vld [vmem:[%s3073_s1 + $0xbc8] sm:$0xff] }
  0x55   :  { %v381_v36 = vld [vmem:[%s3073_s1 + $0xae0] sm:$0xff]  ;;  %585 = vmatpush.msra.mxu3 %v70_v34  ;;  %527 = vmatpush.msrb.mxu0 %v317_v35  ;;  %v270_v24 = vld [vmem:[%s3073_s1 + $0x768] sm:$0xff] }
  0x56   :  { %v313_v39 = vld [vmem:[%s3073_s1 + $0x8c0] sm:$0xff]  ;;  %547 = vmatpush.msrb.mxu1 %v381_v36  ;;  %608 = vmatpush.msrb.mxu2 %v122_v49  ;;  %v214_v25 = vld [vmem:[%s3073_s1 + $0x5a8] sm:$0xff] }
  0x57   :  { %v377_v40 = vld [vmem:[%s3073_s1 + $0xac0] sm:$0xff]  ;;  %586 = vmatpush.msra.mxu3 %v66_v38  ;;  %528 = vmatpush.msrb.mxu0 %v313_v39  ;;  %v338_v26 = vld [vmem:[%s3073_s1 + $0x988] sm:$0xff] }
  0x58   :  { %v309_v43 = vld [vmem:[%s3073_s1 + $0x8a0] sm:$0xff]  ;;  %548 = vmatpush.msrb.mxu1 %v377_v40  ;;  %609 = vmatpush.msrb.mxu2 %v118_v53  ;;  %v406_v27 = vld [vmem:[%s3073_s1 + $0xba8] sm:$0xff] }
  0x59   :  { %v373_v44 = vld [vmem:[%s3073_s1 + $0xaa0] sm:$0xff]  ;;  %587 = vmatpush.msra.mxu3 %v62_v42  ;;  %529 = vmatpush.msrb.mxu0 %v309_v43  ;;  %v266_v28 = vld [vmem:[%s3073_s1 + $0x748] sm:$0xff] }
  0x5a   :  { %v305_v47 = vld [vmem:[%s3073_s1 + $0x880] sm:$0xff]  ;;  %549 = vmatpush.msrb.mxu1 %v373_v44  ;;  %610 = vmatpush.msrb.mxu2 %v114_v57  ;;  %v210_v29 = vld [vmem:[%s3073_s1 + $0x588] sm:$0xff] }
  0x5b   :  { %v369_v48 = vld [vmem:[%s3073_s1 + $0xa80] sm:$0xff]  ;;  %588 = vmatpush.msra.mxu3 %v58_v46  ;;  %530 = vmatpush.msrb.mxu0 %v305_v47  ;;  %v334_v30 = vld [vmem:[%s3073_s1 + $0x968] sm:$0xff] }
  0x5c   :  { %v301_v51 = vld [vmem:[%s3073_s1 + $0x860] sm:$0xff]  ;;  %550 = vmatpush.msrb.mxu1 %v369_v48  ;;  %1352 = vmatmul.msk.f32.vlgmr.msrb.gmra.mxu3 %vm435_vm0, %v1797_v61  ;;  %v402_v31 = vld [vmem:[%s3073_s1 + $0xb88] sm:$0xff] }
  0x5d   :  { %v365_v52 = vld [vmem:[%s3073_s1 + $0xa60] sm:$0xff]  ;;  %589 = vmatpush.msra.mxu3 %v54_v50  ;;  %531 = vmatpush.msrb.mxu0 %v301_v51  ;;  %v262_v32 = vld [vmem:[%s3073_s1 + $0x728] sm:$0xff] }
  0x5e   :  { %v297_v55 = vld [vmem:[%s3073_s1 + $0x840] sm:$0xff]  ;;  %551 = vmatpush.msrb.mxu1 %v365_v52  ;;  %611 = vmatpush.msrb.mxu2 %v110_v63  ;;  %v206_v33 = vld [vmem:[%s3073_s1 + $0x568] sm:$0xff] }
  0x5f   :  { %v361_v56 = vld [vmem:[%s3073_s1 + $0xa40] sm:$0xff]  ;;  %590 = vmatpush.msra.mxu3 %v50_v54  ;;  %532 = vmatpush.msrb.mxu0 %v297_v55  ;;  %v330_v34 = vld [vmem:[%s3073_s1 + $0x948] sm:$0xff] }
  0x60   :  { %v293_v59 = vld [vmem:[%s3073_s1 + $0x820] sm:$0xff]  ;;  %552 = vmatpush.msrb.mxu1 %v361_v56  ;;  %612 = vmatpush.msrb.mxu2 %v106_v5  ;;  %v398_v35 = vld [vmem:[%s3073_s1 + $0xb68] sm:$0xff] }
  0x61   :  { %v357_v60 = vld [vmem:[%s3073_s1 + $0xa20] sm:$0xff]  ;;  %591 = vmatpush.msra.mxu3 %v46_v58  ;;  %533 = vmatpush.msrb.mxu0 %v293_v59  ;;  %v258_v36 = vld [vmem:[%s3073_s1 + $0x708] sm:$0xff] }
  0x62   :  { %v289_v0 = vld [vmem:[%s3073_s1 + $0x800] sm:$0xff]  ;;  %553 = vmatpush.msrb.mxu1 %v357_v60  ;;  %613 = vmatpush.msrb.mxu2 %v102_v11  ;;  %v202_v37 = vld [vmem:[%s3073_s1 + $0x548] sm:$0xff] }
  0x63   :  { %v353_v1 = vld [vmem:[%s3073_s1 + $0xa00] sm:$0xff]  ;;  %592 = vmatpush.msra.mxu3 %v42_v62  ;;  %534 = vmatpush.msrb.mxu0 %v289_v0  ;;  %v326_v38 = vld [vmem:[%s3073_s1 + $0x928] sm:$0xff] }
  0x64   :  { %v1816_v2 = vld [vmem:[%s3074_s0 + $0x20] sm:$0xff]  ;;  %554 = vmatpush.msrb.mxu1 %v353_v1  ;;  %614 = vmatpush.msrb.mxu2 %v98_v16  ;;  %v394_v39 = vld [vmem:[%s3073_s1 + $0xb48] sm:$0xff] }
  0x65   :  { %535 = vmatmul.f32.vlgmr.msrb.gmra.mxu0 %v1816_v2  ;;  %593 = vmatpush.msra.mxu3 %v38_v4  ;;  %v254_v40 = vld [vmem:[%s3073_s1 + $0x6e8] sm:$0xff] }
  0x66   :  { %639 = vmatpush.msra.mxu1 %v286_v6  ;;  %619 = vmatpush.msra.mxu0 %v222_v15  ;;  %v198_v41 = vld [vmem:[%s3073_s1 + $0x528] sm:$0xff]  ;;  %v95_v15 = vld [vmem:[%s3073_s1 + $0x1f0] sm:$0xff] }
  0x67   :  { %555 = vmatmul.f32.vlgmr.msrb.gmra.mxu1 %v1830_v9  ;;  %594 = vmatpush.msra.mxu3 %v34_v10  ;;  %v322_v42 = vld [vmem:[%s3073_s1 + $0x908] sm:$0xff] }
  0x68   :  { %640 = vmatpush.msra.mxu1 %v282_v13  ;;  %679 = vmatpush.msra.mxu2 %v414_v19  ;;  %v390_v43 = vld [vmem:[%s3073_s1 + $0xb28] sm:$0xff]  ;;  %v91_v19 = vld [vmem:[%s3073_s1 + $0x1d0] sm:$0xff] }
  0x69   :  { %659 = vmatpush.msrb.mxu3 %v350_v14  ;;  %620 = vmatpush.msra.mxu0 %v218_v21  ;;  %v250_v44 = vld [vmem:[%s3073_s1 + $0x6c8] sm:$0xff] }
  0x6a   :  { %641 = vmatpush.msra.mxu1 %v278_v17  ;;  %680 = vmatpush.msra.mxu2 %v410_v23  ;;  %v194_v45 = vld [vmem:[%s3073_s1 + $0x508] sm:$0xff]  ;;  %v87_v23 = vld [vmem:[%s3073_s1 + $0x1b0] sm:$0xff] }
  0x6b   :  { %660 = vmatpush.msrb.mxu3 %v346_v18  ;;  %621 = vmatpush.msra.mxu0 %v214_v25  ;;  %v318_v46 = vld [vmem:[%s3073_s1 + $0x8e8] sm:$0xff]  ;;  %v287_v25 = vld [vmem:[%s3073_s1 + $0x7f0] sm:$0xff] }
  0x6c   :  { %642 = vmatpush.msra.mxu1 %v274_v20  ;;  %681 = vmatpush.msra.mxu2 %v406_v27  ;;  %v386_v47 = vld [vmem:[%s3073_s1 + $0xb08] sm:$0xff]  ;;  %v159_v20 = vld [vmem:[%s3073_s1 + $0x3f0] sm:$0xff] }
  0x6d   :  { %661 = vmatpush.msrb.mxu3 %v342_v22  ;;  %622 = vmatpush.msra.mxu0 %v210_v29  ;;  %v246_v48 = vld [vmem:[%s3073_s1 + $0x6a8] sm:$0xff]  ;;  %v283_v29 = vld [vmem:[%s3073_s1 + $0x7d0] sm:$0xff] }
  0x6e   :  { %643 = vmatpush.msra.mxu1 %v270_v24  ;;  %682 = vmatpush.msra.mxu2 %v402_v31  ;;  %v190_v49 = vld [vmem:[%s3073_s1 + $0x4e8] sm:$0xff]  ;;  %v155_v24 = vld [vmem:[%s3073_s1 + $0x3d0] sm:$0xff] }
  0x6f   :  { %662 = vmatpush.msrb.mxu3 %v338_v26  ;;  %623 = vmatpush.msra.mxu0 %v206_v33  ;;  %v314_v50 = vld [vmem:[%s3073_s1 + $0x8c8] sm:$0xff]  ;;  %v83_v26 = vld [vmem:[%s3073_s1 + $0x190] sm:$0xff] }
  0x70   :  { %644 = vmatpush.msra.mxu1 %v266_v28  ;;  %683 = vmatpush.msra.mxu2 %v398_v35  ;;  %v382_v51 = vld [vmem:[%s3073_s1 + $0xae8] sm:$0xff]  ;;  %v151_v28 = vld [vmem:[%s3073_s1 + $0x3b0] sm:$0xff] }
  0x71   :  { %663 = vmatpush.msrb.mxu3 %v334_v30  ;;  %624 = vmatpush.msra.mxu0 %v202_v37  ;;  %v242_v52 = vld [vmem:[%s3073_s1 + $0x688] sm:$0xff]  ;;  %v79_v30 = vld [vmem:[%s3073_s1 + $0x170] sm:$0xff] }
  0x72   :  { %645 = vmatpush.msra.mxu1 %v262_v32  ;;  %684 = vmatpush.msra.mxu2 %v394_v39  ;;  %v186_v53 = vld [vmem:[%s3073_s1 + $0x4c8] sm:$0xff]  ;;  %v147_v32 = vld [vmem:[%s3073_s1 + $0x390] sm:$0xff] }
  0x73   :  { %664 = vmatpush.msrb.mxu3 %v330_v34  ;;  %625 = vmatpush.msra.mxu0 %v198_v41  ;;  %v310_v54 = vld [vmem:[%s3073_s1 + $0x8a8] sm:$0xff]  ;;  %v279_v33 = vld [vmem:[%s3073_s1 + $0x7b0] sm:$0xff] }
  0x74   :  { %646 = vmatpush.msra.mxu1 %v258_v36  ;;  %685 = vmatpush.msra.mxu2 %v390_v43  ;;  %v378_v55 = vld [vmem:[%s3073_s1 + $0xac8] sm:$0xff]  ;;  %v75_v34 = vld [vmem:[%s3073_s1 + $0x150] sm:$0xff] }
  0x75   :  { %665 = vmatpush.msrb.mxu3 %v326_v38  ;;  %626 = vmatpush.msra.mxu0 %v194_v45  ;;  %v238_v56 = vld [vmem:[%s3073_s1 + $0x668] sm:$0xff]  ;;  %v223_v35 = vld [vmem:[%s3073_s1 + $0x5f0] sm:$0xff] }
  0x76   :  { %647 = vmatpush.msra.mxu1 %v254_v40  ;;  %686 = vmatpush.msra.mxu2 %v386_v47  ;;  %v182_v57 = vld [vmem:[%s3073_s1 + $0x4a8] sm:$0xff]  ;;  %v143_v36 = vld [vmem:[%s3073_s1 + $0x370] sm:$0xff] }
  0x77   :  { %666 = vmatpush.msrb.mxu3 %v322_v42  ;;  %627 = vmatpush.msra.mxu0 %v190_v49  ;;  %v306_v58 = vld [vmem:[%s3073_s1 + $0x888] sm:$0xff]  ;;  %v275_v37 = vld [vmem:[%s3073_s1 + $0x790] sm:$0xff] }
  0x78   :  { %648 = vmatpush.msra.mxu1 %v250_v44  ;;  %687 = vmatpush.msra.mxu2 %v382_v51  ;;  %v374_v59 = vld [vmem:[%s3073_s1 + $0xaa8] sm:$0xff]  ;;  %v71_v38 = vld [vmem:[%s3073_s1 + $0x130] sm:$0xff] }
  0x79   :  { %667 = vmatpush.msrb.mxu3 %v318_v46  ;;  %628 = vmatpush.msra.mxu0 %v186_v53  ;;  %v234_v60 = vld [vmem:[%s3073_s1 + $0x648] sm:$0xff]  ;;  %v219_v39 = vld [vmem:[%s3073_s1 + $0x5d0] sm:$0xff] }
  0x7a   :  { %649 = vmatpush.msra.mxu1 %v246_v48  ;;  %688 = vmatpush.msra.mxu2 %v378_v55  ;;  %v178_v62 = vld [vmem:[%s3073_s1 + $0x488] sm:$0xff]  ;;  %v139_v40 = vld [vmem:[%s3073_s1 + $0x350] sm:$0xff] }
  0x7b   :  { %668 = vmatpush.msrb.mxu3 %v314_v50  ;;  %629 = vmatpush.msra.mxu0 %v182_v57  ;;  %v302_v63 = vld [vmem:[%s3073_s1 + $0x868] sm:$0xff]  ;;  %v271_v41 = vld [vmem:[%s3073_s1 + $0x770] sm:$0xff] }
  0x7c   :  { %650 = vmatpush.msra.mxu1 %v242_v52  ;;  %689 = vmatpush.msra.mxu2 %v374_v59  ;;  %v370_v0 = vld [vmem:[%s3073_s1 + $0xa88] sm:$0xff]  ;;  %v67_v42 = vld [vmem:[%s3073_s1 + $0x110] sm:$0xff] }
  0x7d   :  { %669 = vmatpush.msrb.mxu3 %v310_v54  ;;  %v230_v1 = vld [vmem:[%s3073_s1 + $0x628] sm:$0xff]  ;;  %630 = vmatpush.msra.mxu0 %v178_v62  ;;  %v215_v43 = vld [vmem:[%s3073_s1 + $0x5b0] sm:$0xff] }
  0x7e   :  { %651 = vmatpush.msra.mxu1 %v238_v56  ;;  %595 = vmatmul.f32.vlgmr.msra.gmra.mxu3 %v1625_v7  ;;  %v174_v4 = vld [vmem:[%s3073_s1 + $0x468] sm:$0xff]  ;;  %v135_v44 = vld [vmem:[%s3073_s1 + $0x330] sm:$0xff] }
  0x7f   :  { %670 = vmatpush.msrb.mxu3 %v306_v58  ;;  %v298_v5 = vld [vmem:[%s3073_s1 + $0x848] sm:$0xff]  ;;  %690 = vmatpush.msra.mxu2 %v370_v0  ;;  %v267_v45 = vld [vmem:[%s3073_s1 + $0x750] sm:$0xff] }
  0x80   :  { %652 = vmatpush.msra.mxu1 %v234_v60  ;;  %v366_v6 = vld [vmem:[%s3073_s1 + $0xa68] sm:$0xff]  ;;  %615 = vmatmul.f32.vlgmr.msrb.gmra.mxu2 %v1646_v12  ;;  %v63_v46 = vld [vmem:[%s3073_s1 + $0xf0] sm:$0xff] }
  0x81   :  { %671 = vmatpush.msrb.mxu3 %v302_v63  ;;  %v226_v10 = vld [vmem:[%s3073_s1 + $0x608] sm:$0xff]  ;;  %631 = vmatpush.msra.mxu0 %v174_v4  ;;  %v211_v47 = vld [vmem:[%s3073_s1 + $0x590] sm:$0xff] }
  0x82   :  { %653 = vmatpush.msra.mxu1 %v230_v1  ;;  %v170_v11 = vld [vmem:[%s3073_s1 + $0x448] sm:$0xff]  ;;  %691 = vmatpush.msra.mxu2 %v366_v6  ;;  %v131_v48 = vld [vmem:[%s3073_s1 + $0x310] sm:$0xff] }
  0x83   :  { %v294_v13 = vld [vmem:[%s3073_s1 + $0x828] sm:$0xff]  ;;  %672 = vmatpush.msrb.mxu3 %v298_v5  ;;  %632 = vmatpush.msra.mxu0 %v170_v11  ;;  %v263_v49 = vld [vmem:[%s3073_s1 + $0x730] sm:$0xff] }
  0x84   :  { %v362_v14 = vld [vmem:[%s3073_s1 + $0xa48] sm:$0xff]  ;;  %654 = vmatpush.msra.mxu1 %v226_v10  ;;  %v59_v50 = vld [vmem:[%s3073_s1 + $0xd0] sm:$0xff] }
  0x85   :  { %v166_v16 = vld [vmem:[%s3073_s1 + $0x428] sm:$0xff]  ;;  %673 = vmatpush.msrb.mxu3 %v294_v13  ;;  %692 = vmatpush.msra.mxu2 %v362_v14  ;;  %v207_v51 = vld [vmem:[%s3073_s1 + $0x570] sm:$0xff] }
  0x86   :  { %v290_v17 = vld [vmem:[%s3073_s1 + $0x808] sm:$0xff]  ;;  %719 = vmatpush.msrb.mxu1 %v95_v15  ;;  %633 = vmatpush.msra.mxu0 %v166_v16  ;;  %v127_v52 = vld [vmem:[%s3073_s1 + $0x2f0] sm:$0xff] }
  0x87   :  { %v358_v18 = vld [vmem:[%s3073_s1 + $0xa28] sm:$0xff]  ;;  %674 = vmatpush.msrb.mxu3 %v290_v17  ;;  %655 = vmatmul.f32.vlgmr.msra.gmra.mxu1 %v1631_v8  ;;  %v259_v53 = vld [vmem:[%s3073_s1 + $0x710] sm:$0xff] }
  0x88   :  { %v162_v21 = vld [vmem:[%s3073_s1 + $0x408] sm:$0xff]  ;;  %693 = vmatpush.msra.mxu2 %v358_v18  ;;  %720 = vmatpush.msrb.mxu1 %v91_v19  ;;  %v55_v54 = vld [vmem:[%s3073_s1 + $0xb0] sm:$0xff] }
  0x89   :  { %v354_v22 = vld [vmem:[%s3073_s1 + $0xa08] sm:$0xff]  ;;  %675 = vmatmul.f32.vlgmr.msrb.gmra.mxu3 %v1816_v2  ;;  %634 = vmatpush.msra.mxu0 %v162_v21  ;;  %v203_v55 = vld [vmem:[%s3073_s1 + $0x550] sm:$0xff] }
  0x8a   :  { %739 = vmatpush.msra.mxu3 %v159_v20  ;;  %694 = vmatpush.msra.mxu2 %v354_v22  ;;  %v422_v27 = vld [vmem:[%s3073_s1 + $0xc28] sm:$0xff]  ;;  %v123_v56 = vld [vmem:[%s3073_s1 + $0x2d0] sm:$0xff] }
  0x8b   :  { %721 = vmatpush.msrb.mxu1 %v87_v23  ;;  %635 = vmatmul.f32.vlgmr.msra.gmra.mxu0 %v1611_v3  ;;  %v418_v31 = vld [vmem:[%s3073_s1 + $0xc08] sm:$0xff]  ;;  %v255_v57 = vld [vmem:[%s3073_s1 + $0x6f0] sm:$0xff] }
  0x8c   :  { %695 = vmatmul.f32.vlgmr.msra.gmra.mxu2 %v1830_v9  ;;  %740 = vmatpush.msra.mxu3 %v155_v24  ;;  %v51_v58 = vld [vmem:[%s3073_s1 + $0x90] sm:$0xff] }
  0x8d   :  { %779 = vmatpush.msrb.mxu2 %v287_v25  ;;  %722 = vmatpush.msrb.mxu1 %v83_v26  ;;  %v199_v59 = vld [vmem:[%s3073_s1 + $0x530] sm:$0xff] }
  0x8e   :  { %713 = vmatpush.msrb.mxu0 %v422_v27  ;;  %741 = vmatpush.msra.mxu3 %v151_v28  ;;  %v119_v60 = vld [vmem:[%s3073_s1 + $0x2b0] sm:$0xff] }
  0x8f   :  { %780 = vmatpush.msrb.mxu2 %v283_v29  ;;  %723 = vmatpush.msrb.mxu1 %v79_v30  ;;  %v251_v62 = vld [vmem:[%s3073_s1 + $0x6d0] sm:$0xff] }
  0x90   :  { %714 = vmatpush.msrb.mxu0 %v418_v31  ;;  %742 = vmatpush.msra.mxu3 %v147_v32  ;;  %v47_v63 = vld [vmem:[%s3073_s1 + $0x70] sm:$0xff]  ;;  %v96_v32 = vld [vmem:[%s3073_s1 + $0x1f8] sm:$0xff] }
  0x91   :  { %781 = vmatpush.msrb.mxu2 %v279_v33  ;;  %724 = vmatpush.msrb.mxu1 %v75_v34  ;;  %v195_v0 = vld [vmem:[%s3073_s1 + $0x510] sm:$0xff] }
  0x92   :  { %759 = vmatpush.msra.mxu0 %v223_v35  ;;  %743 = vmatpush.msra.mxu3 %v143_v36  ;;  %v115_v1 = vld [vmem:[%s3073_s1 + $0x290] sm:$0xff]  ;;  %v92_v36 = vld [vmem:[%s3073_s1 + $0x1d8] sm:$0xff] }
  0x93   :  { %782 = vmatpush.msrb.mxu2 %v275_v37  ;;  %725 = vmatpush.msrb.mxu1 %v71_v38  ;;  %v247_v4 = vld [vmem:[%s3073_s1 + $0x6b0] sm:$0xff] }
  0x94   :  { %760 = vmatpush.msra.mxu0 %v219_v39  ;;  %744 = vmatpush.msra.mxu3 %v139_v40  ;;  %v43_v5 = vld [vmem:[%s3073_s1 + $0x50] sm:$0xff]  ;;  %v88_v39 = vld [vmem:[%s3073_s1 + $0x1b8] sm:$0xff] }
  0x95   :  { %1353 = vmatmul.msk.f32.vlgmr.msrb.gmra.mxu0 %vm435_vm0, %v1797_v61  ;;  %783 = vmatpush.msrb.mxu2 %v271_v41  ;;  %v191_v6 = vld [vmem:[%s3073_s1 + $0x4f0] sm:$0xff] }
  0x96   :  { %726 = vmatpush.msrb.mxu1 %v67_v42  ;;  %761 = vmatpush.msra.mxu0 %v215_v43  ;;  %v111_v10 = vld [vmem:[%s3073_s1 + $0x270] sm:$0xff]  ;;  %v84_v43 = vld [vmem:[%s3073_s1 + $0x198] sm:$0xff] }
  0x97   :  { %745 = vmatpush.msra.mxu3 %v135_v44  ;;  %784 = vmatpush.msrb.mxu2 %v267_v45  ;;  %v243_v11 = vld [vmem:[%s3073_s1 + $0x690] sm:$0xff] }
  0x98   :  { %727 = vmatpush.msrb.mxu1 %v63_v46  ;;  %762 = vmatpush.msra.mxu0 %v211_v47  ;;  %v39_v13 = vld [vmem:[%s3073_s1 + $0x30] sm:$0xff]  ;;  %v160_v46 = vld [vmem:[%s3073_s1 + $0x3f8] sm:$0xff] }
  0x99   :  { %746 = vmatpush.msra.mxu3 %v131_v48  ;;  %785 = vmatpush.msrb.mxu2 %v263_v49  ;;  %v187_v14 = vld [vmem:[%s3073_s1 + $0x4d0] sm:$0xff]  ;;  %v76_v49 = vld [vmem:[%s3073_s1 + $0x158] sm:$0xff] }
  0x9a   :  { %728 = vmatpush.msrb.mxu1 %v59_v50  ;;  %763 = vmatpush.msra.mxu0 %v207_v51  ;;  %v107_v15 = vld [vmem:[%s3073_s1 + $0x250] sm:$0xff]  ;;  %v156_v50 = vld [vmem:[%s3073_s1 + $0x3d8] sm:$0xff] }
  0x9b   :  { %747 = vmatpush.msra.mxu3 %v127_v52  ;;  %786 = vmatpush.msrb.mxu2 %v259_v53  ;;  %v239_v16 = vld [vmem:[%s3073_s1 + $0x670] sm:$0xff]  ;;  %v72_v53 = vld [vmem:[%s3073_s1 + $0x138] sm:$0xff] }
  0x9c   :  { %729 = vmatpush.msrb.mxu1 %v55_v54  ;;  %764 = vmatpush.msra.mxu0 %v203_v55  ;;  %v35_v17 = vld [vmem:[%s3073_s1 + $0x10] sm:$0xff] }
  0x9d   :  { %748 = vmatpush.msra.mxu3 %v123_v56  ;;  %787 = vmatpush.msrb.mxu2 %v255_v57  ;;  %v183_v18 = vld [vmem:[%s3073_s1 + $0x4b0] sm:$0xff]  ;;  %v68_v56 = vld [vmem:[%s3073_s1 + $0x118] sm:$0xff] }
  0x9e   :  { %730 = vmatpush.msrb.mxu1 %v51_v58  ;;  %765 = vmatpush.msra.mxu0 %v199_v59  ;;  %v103_v19 = vld [vmem:[%s3073_s1 + $0x230] sm:$0xff]  ;;  %v148_v57 = vld [vmem:[%s3073_s1 + $0x398] sm:$0xff] }
  0x9f   :  { %749 = vmatpush.msra.mxu3 %v119_v60  ;;  %788 = vmatpush.msrb.mxu2 %v251_v62  ;;  %v235_v20 = vld [vmem:[%s3073_s1 + $0x650] sm:$0xff]  ;;  %v64_v60 = vld [vmem:[%s3073_s1 + $0xf8] sm:$0xff] }
  0xa0   :  { %731 = vmatpush.msrb.mxu1 %v47_v63  ;;  %766 = vmatpush.msra.mxu0 %v195_v0  ;;  %v351_v21 = vld [vmem:[%s3073_s1 + $0x9f0] sm:$0xff]  ;;  %v144_v62 = vld [vmem:[%s3073_s1 + $0x378] sm:$0xff] }
  0xa1   :  { %750 = vmatpush.msra.mxu3 %v115_v1  ;;  %789 = vmatpush.msrb.mxu2 %v247_v4  ;;  %v179_v22 = vld [vmem:[%s3073_s1 + $0x490] sm:$0xff]  ;;  %v60_v1 = vld [vmem:[%s3073_s1 + $0xd8] sm:$0xff] }
  0xa2   :  { %732 = vmatpush.msrb.mxu1 %v43_v5  ;;  %767 = vmatpush.msra.mxu0 %v191_v6  ;;  %v99_v23 = vld [vmem:[%s3073_s1 + $0x210] sm:$0xff]  ;;  %v140_v4 = vld [vmem:[%s3073_s1 + $0x358] sm:$0xff] }
  0xa3   :  { %751 = vmatpush.msra.mxu3 %v111_v10  ;;  %790 = vmatpush.msrb.mxu2 %v243_v11  ;;  %v231_v24 = vld [vmem:[%s3073_s1 + $0x630] sm:$0xff]  ;;  %v56_v10 = vld [vmem:[%s3073_s1 + $0xb8] sm:$0xff] }
  0xa4   :  { %733 = vmatpush.msrb.mxu1 %v39_v13  ;;  %768 = vmatpush.msra.mxu0 %v187_v14  ;;  %v347_v25 = vld [vmem:[%s3073_s1 + $0x9d0] sm:$0xff]  ;;  %v136_v11 = vld [vmem:[%s3073_s1 + $0x338] sm:$0xff] }
  0xa5   :  { %752 = vmatpush.msra.mxu3 %v107_v15  ;;  %791 = vmatpush.msrb.mxu2 %v239_v16  ;;  %v175_v26 = vld [vmem:[%s3073_s1 + $0x470] sm:$0xff]  ;;  %v52_v15 = vld [vmem:[%s3073_s1 + $0x98] sm:$0xff] }
  0xa6   :  { %734 = vmatpush.msrb.mxu1 %v35_v17  ;;  %769 = vmatpush.msra.mxu0 %v183_v18  ;;  %v415_v27 = vld [vmem:[%s3073_s1 + $0xbf0] sm:$0xff]  ;;  %v132_v16 = vld [vmem:[%s3073_s1 + $0x318] sm:$0xff] }
  0xa7   :  { %753 = vmatpush.msra.mxu3 %v103_v19  ;;  %792 = vmatpush.msrb.mxu2 %v235_v20  ;;  %v227_v28 = vld [vmem:[%s3073_s1 + $0x610] sm:$0xff]  ;;  %v48_v19 = vld [vmem:[%s3073_s1 + $0x78] sm:$0xff] }
  0xa8   :  { %799 = vmatpush.msra.mxu1 %v351_v21  ;;  %770 = vmatpush.msra.mxu0 %v179_v22  ;;  %v343_v29 = vld [vmem:[%s3073_s1 + $0x9b0] sm:$0xff]  ;;  %v128_v20 = vld [vmem:[%s3073_s1 + $0x2f8] sm:$0xff] }
  0xa9   :  { %754 = vmatpush.msra.mxu3 %v99_v23  ;;  %793 = vmatpush.msrb.mxu2 %v231_v24  ;;  %v171_v30 = vld [vmem:[%s3073_s1 + $0x450] sm:$0xff]  ;;  %v44_v23 = vld [vmem:[%s3073_s1 + $0x58] sm:$0xff] }
  0xaa   :  { %800 = vmatpush.msra.mxu1 %v347_v25  ;;  %771 = vmatpush.msra.mxu0 %v175_v26  ;;  %v411_v31 = vld [vmem:[%s3073_s1 + $0xbd0] sm:$0xff]  ;;  %v124_v24 = vld [vmem:[%s3073_s1 + $0x2d8] sm:$0xff] }
  0xab   :  { %819 = vmatpush.msrb.mxu3 %v415_v27  ;;  %794 = vmatpush.msrb.mxu2 %v227_v28  ;;  %v339_v33 = vld [vmem:[%s3073_s1 + $0x990] sm:$0xff]  ;;  %v224_v26 = vld [vmem:[%s3073_s1 + $0x5f8] sm:$0xff] }
  0xac   :  { %801 = vmatpush.msra.mxu1 %v343_v29  ;;  %755 = vmatmul.f32.vlgmr.msra.gmra.mxu3 %v1646_v12  ;;  %v167_v34 = vld [vmem:[%s3073_s1 + $0x430] sm:$0xff]  ;;  %v40_v27 = vld [vmem:[%s3073_s1 + $0x38] sm:$0xff] }
  0xad   :  { %v407_v35 = vld [vmem:[%s3073_s1 + $0xbb0] sm:$0xff]  ;;  %772 = vmatpush.msra.mxu0 %v171_v30  ;;  %820 = vmatpush.msrb.mxu3 %v411_v31  ;;  %v120_v28 = vld [vmem:[%s3073_s1 + $0x2b8] sm:$0xff] }
  0xae   :  { %v335_v37 = vld [vmem:[%s3073_s1 + $0x970] sm:$0xff]  ;;  %859 = vmatpush.msra.mxu2 %v96_v32  ;;  %802 = vmatpush.msra.mxu1 %v339_v33  ;;  %v220_v29 = vld [vmem:[%s3073_s1 + $0x5d8] sm:$0xff] }
  0xaf   :  { %v163_v12 = vld [vmem:[%s3073_s1 + $0x410] sm:$0xff]  ;;  %773 = vmatpush.msra.mxu0 %v167_v34  ;;  %821 = vmatpush.msrb.mxu3 %v407_v35  ;;  %v36_v30 = vld [vmem:[%s3073_s1 + $0x18] sm:$0xff] }
  0xb0   :  { %v403_v38 = vld [vmem:[%s3073_s1 + $0xb90] sm:$0xff]  ;;  %860 = vmatpush.msra.mxu2 %v92_v36  ;;  %803 = vmatpush.msra.mxu1 %v335_v37  ;;  %v116_v31 = vld [vmem:[%s3073_s1 + $0x298] sm:$0xff] }
  0xb1   :  { %v331_v40 = vld [vmem:[%s3073_s1 + $0x950] sm:$0xff]  ;;  %735 = vmatmul.f32.vlgmr.msrb.gmra.mxu1 %v1625_v7  ;;  %774 = vmatpush.msra.mxu0 %v163_v12  ;;  %v352_v32 = vld [vmem:[%s3073_s1 + $0x9f8] sm:$0xff] }
  0xb2   :  { %v423_v41 = vld [vmem:[%s3073_s1 + $0xc30] sm:$0xff]  ;;  %795 = vmatmul.f32.vlgmr.msrb.gmra.mxu2 %v1631_v8  ;;  %822 = vmatpush.msrb.mxu3 %v403_v38  ;;  %v80_v8 = vld [vmem:[%s3073_s1 + $0x178] sm:$0xff] }
  0xb3   :  { %v399_v42 = vld [vmem:[%s3073_s1 + $0xb70] sm:$0xff]  ;;  %861 = vmatpush.msra.mxu2 %v88_v39  ;;  %804 = vmatpush.msra.mxu1 %v331_v40  ;;  %v284_v33 = vld [vmem:[%s3073_s1 + $0x7d8] sm:$0xff] }
  0xb4   :  { %v327_v7 = vld [vmem:[%s3073_s1 + $0x930] sm:$0xff]  ;;  %853 = vmatpush.msrb.mxu0 %v423_v41  ;;  %823 = vmatpush.msrb.mxu3 %v399_v42  ;;  %v112_v34 = vld [vmem:[%s3073_s1 + $0x278] sm:$0xff] }
  0xb5   :  { %v419_v44 = vld [vmem:[%s3073_s1 + $0xc10] sm:$0xff]  ;;  %862 = vmatpush.msra.mxu2 %v84_v43  ;;  %805 = vmatpush.msra.mxu1 %v327_v7  ;;  %v348_v35 = vld [vmem:[%s3073_s1 + $0x9d8] sm:$0xff] }
  0xb6   :  { %v395_v45 = vld [vmem:[%s3073_s1 + $0xb50] sm:$0xff]  ;;  %854 = vmatpush.msrb.mxu0 %v419_v44  ;;  %v216_v36 = vld [vmem:[%s3073_s1 + $0x5b8] sm:$0xff] }
  0xb7   :  { %v323_v47 = vld [vmem:[%s3073_s1 + $0x910] sm:$0xff]  ;;  %824 = vmatpush.msrb.mxu3 %v395_v45  ;;  %775 = vmatmul.f32.vlgmr.msra.gmra.mxu0 %v1611_v3  ;;  %v152_v3 = vld [vmem:[%s3073_s1 + $0x3b8] sm:$0xff] }
  0xb8   :  { %v391_v48 = vld [vmem:[%s3073_s1 + $0xb30] sm:$0xff]  ;;  %863 = vmatpush.msra.mxu2 %v80_v8  ;;  %879 = vmatpush.msra.mxu0 %v160_v46  ;;  %v108_v37 = vld [vmem:[%s3073_s1 + $0x258] sm:$0xff] }
  0xb9   :  { %v319_v51 = vld [vmem:[%s3073_s1 + $0x8f0] sm:$0xff]  ;;  %806 = vmatpush.msra.mxu1 %v323_v47  ;;  %825 = vmatpush.msrb.mxu3 %v391_v48  ;;  %v344_v12 = vld [vmem:[%s3073_s1 + $0x9b8] sm:$0xff] }
  0xba   :  { %v387_v52 = vld [vmem:[%s3073_s1 + $0xb10] sm:$0xff]  ;;  %864 = vmatpush.msra.mxu2 %v76_v49  ;;  %880 = vmatpush.msra.mxu0 %v156_v50  ;;  %v276_v38 = vld [vmem:[%s3073_s1 + $0x798] sm:$0xff] }
  0xbb   :  { %v315_v54 = vld [vmem:[%s3073_s1 + $0x8d0] sm:$0xff]  ;;  %807 = vmatpush.msra.mxu1 %v319_v51  ;;  %826 = vmatpush.msrb.mxu3 %v387_v52  ;;  %v212_v39 = vld [vmem:[%s3073_s1 + $0x598] sm:$0xff] }
  0xbc   :  { %v383_v55 = vld [vmem:[%s3073_s1 + $0xaf0] sm:$0xff]  ;;  %865 = vmatpush.msra.mxu2 %v72_v53  ;;  %881 = vmatpush.msra.mxu0 %v152_v3  ;;  %v104_v40 = vld [vmem:[%s3073_s1 + $0x238] sm:$0xff] }
  0xbd   :  { %v311_v58 = vld [vmem:[%s3073_s1 + $0x8b0] sm:$0xff]  ;;  %808 = vmatpush.msra.mxu1 %v315_v54  ;;  %827 = vmatpush.msrb.mxu3 %v383_v55  ;;  %v272_v41 = vld [vmem:[%s3073_s1 + $0x778] sm:$0xff] }
  0xbe   :  { %v379_v59 = vld [vmem:[%s3073_s1 + $0xad0] sm:$0xff]  ;;  %866 = vmatpush.msra.mxu2 %v68_v56  ;;  %882 = vmatpush.msra.mxu0 %v148_v57  ;;  %v208_v42 = vld [vmem:[%s3073_s1 + $0x578] sm:$0xff] }
  0xbf   :  { %v307_v63 = vld [vmem:[%s3073_s1 + $0x890] sm:$0xff]  ;;  %809 = vmatpush.msra.mxu1 %v311_v58  ;;  %828 = vmatpush.msrb.mxu3 %v379_v59  ;;  %v100_v43 = vld [vmem:[%s3073_s1 + $0x218] sm:$0xff] }
  0xc0   :  { %v375_v0 = vld [vmem:[%s3073_s1 + $0xab0] sm:$0xff]  ;;  %867 = vmatpush.msra.mxu2 %v64_v60  ;;  %883 = vmatpush.msra.mxu0 %v144_v62  ;;  %v336_v7 = vld [vmem:[%s3073_s1 + $0x978] sm:$0xff] }
  0xc1   :  { %v303_v5 = vld [vmem:[%s3073_s1 + $0x870] sm:$0xff]  ;;  %810 = vmatpush.msra.mxu1 %v307_v63  ;;  %829 = vmatpush.msrb.mxu3 %v375_v0  ;;  %v268_v44 = vld [vmem:[%s3073_s1 + $0x758] sm:$0xff] }
  0xc2   :  { %v371_v6 = vld [vmem:[%s3073_s1 + $0xa90] sm:$0xff]  ;;  %868 = vmatpush.msra.mxu2 %v60_v1  ;;  %884 = vmatpush.msra.mxu0 %v140_v4  ;;  %v416_v45 = vld [vmem:[%s3073_s1 + $0xbf8] sm:$0xff] }
  0xc3   :  { %v299_v13 = vld [vmem:[%s3073_s1 + $0x850] sm:$0xff]  ;;  %811 = vmatpush.msra.mxu1 %v303_v5  ;;  %830 = vmatpush.msrb.mxu3 %v371_v6  ;;  %v332_v8 = vld [vmem:[%s3073_s1 + $0x958] sm:$0xff] }
  0xc4   :  { %v367_v14 = vld [vmem:[%s3073_s1 + $0xa70] sm:$0xff]  ;;  %869 = vmatpush.msra.mxu2 %v56_v10  ;;  %885 = vmatpush.msra.mxu0 %v136_v11  ;;  %v204_v46 = vld [vmem:[%s3073_s1 + $0x558] sm:$0xff] }
  0xc5   :  { %v295_v17 = vld [vmem:[%s3073_s1 + $0x830] sm:$0xff]  ;;  %812 = vmatpush.msra.mxu1 %v299_v13  ;;  %831 = vmatpush.msrb.mxu3 %v367_v14  ;;  %v264_v47 = vld [vmem:[%s3073_s1 + $0x738] sm:$0xff] }
  0xc6   :  { %v363_v18 = vld [vmem:[%s3073_s1 + $0xa50] sm:$0xff]  ;;  %870 = vmatpush.msra.mxu2 %v52_v15  ;;  %886 = vmatpush.msra.mxu0 %v132_v16  ;;  %v412_v48 = vld [vmem:[%s3073_s1 + $0xbd8] sm:$0xff] }
  0xc7   :  { %v291_v21 = vld [vmem:[%s3073_s1 + $0x810] sm:$0xff]  ;;  %813 = vmatpush.msra.mxu1 %v295_v17  ;;  %832 = vmatpush.msrb.mxu3 %v363_v18  ;;  %v328_v49 = vld [vmem:[%s3073_s1 + $0x938] sm:$0xff] }
  0xc8   :  { %v359_v22 = vld [vmem:[%s3073_s1 + $0xa30] sm:$0xff]  ;;  %871 = vmatpush.msra.mxu2 %v48_v19  ;;  %887 = vmatpush.msra.mxu0 %v128_v20  ;;  %v200_v50 = vld [vmem:[%s3073_s1 + $0x538] sm:$0xff]  ;;  %v1360_v20 = vld [vmem:[%s3074_s0] sm:$0xff] }
  0xc9   :  { %814 = vmatpush.msra.mxu1 %v291_v21  ;;  %v355_v25 = vld [vmem:[%s3073_s1 + $0xa10] sm:$0xff]  ;;  %833 = vmatpush.msrb.mxu3 %v359_v22  ;;  %v260_v51 = vld [vmem:[%s3073_s1 + $0x718] sm:$0xff] }
  0xca   :  { %815 = vmatmul.f32.vlgmr.msra.gmra.mxu1 %v1816_v2  ;;  %872 = vmatpush.msra.mxu2 %v44_v23  ;;  %v288_v2 = vld [vmem:[%s3073_s1 + $0x7f8] sm:$0xff] }
  0xcb   :  { %888 = vmatpush.msra.mxu0 %v124_v24  ;;  %834 = vmatpush.msrb.mxu3 %v355_v25  ;;  %v408_v52 = vld [vmem:[%s3073_s1 + $0xbb8] sm:$0xff] }
  0xcc   :  { %899 = vmatpush.msrb.mxu1 %v224_v26  ;;  %873 = vmatpush.msra.mxu2 %v40_v27  ;;  %v324_v53 = vld [vmem:[%s3073_s1 + $0x918] sm:$0xff]  ;;  %v2618_v27 = vld [vmem:[%s3075_s2] sm:$0xf] }
  0xcd   :  { %889 = vmatpush.msra.mxu0 %v120_v28  ;;  %835 = vmatmul.f32.vlgmr.msrb.gmra.mxu3 %v1830_v9  ;;  %v280_v9 = vld [vmem:[%s3073_s1 + $0x7b8] sm:$0xff] }
  0xce   :  { %900 = vmatpush.msrb.mxu1 %v220_v29  ;;  %919 = vmatpush.msra.mxu3 %v288_v2  ;;  %v196_v3 = vld [vmem:[%s3073_s1 + $0x518] sm:$0xff]  ;;  %v1033_v29 = vld [vmem:[%s3076_s3 + $0xf0] sm:$0xff] }
  0xcf   :  { %874 = vmatpush.msra.mxu2 %v36_v30  ;;  %890 = vmatpush.msra.mxu0 %v116_v31  ;;  %v256_v54 = vld [vmem:[%s3073_s1 + $0x6f8] sm:$0xff]  ;;  %v427_v31 = vperm.slane %v2618_v27, 0 }
  0xd0   :  { %920 = vmatpush.msra.mxu3 %v284_v33  ;;  %1354 = vmatmul.msk.f32.vlgmr.msrb.gmra.mxu0 %vm435_vm0, %v1797_v61  ;;  %v340_v61 = vld [vmem:[%s3073_s1 + $0x998] sm:$0xff]  ;;  %v1031_v33 = vld [vmem:[%s3076_s3 + $0xe0] sm:$0xff] }
  0xd1   :  { %939 = vmatpush.msrb.mxu2 %v352_v32  ;;  %891 = vmatpush.msra.mxu0 %v112_v34  ;;  %v404_v55 = vld [vmem:[%s3073_s1 + $0xb98] sm:$0xff]  ;;  %v456_v34 = vpop.f32.mrf.mxu0 }
  0xd2   :  { %921 = vmatpush.msra.mxu3 %v280_v9  ;;  %901 = vmatpush.msrb.mxu1 %v216_v36  ;;  %v320_v56 = vld [vmem:[%s3073_s1 + $0x8f8] sm:$0xff]  ;;  %v1362_v36 = vld [vmem:[%s3074_s0 + $0x20] sm:$0xff] }
  0xd3   :  { %940 = vmatpush.msrb.mxu2 %v348_v35  ;;  %892 = vmatpush.msra.mxu0 %v108_v37  ;;  %v192_v57 = vld [vmem:[%s3073_s1 + $0x4f8] sm:$0xff]  ;;  %v1029_v37 = vld [vmem:[%s3076_s3 + $0xd0] sm:$0xff] }
  0xd4   :  { %922 = vmatpush.msra.mxu3 %v276_v38  ;;  %902 = vmatpush.msrb.mxu1 %v212_v39  ;;  %v252_v58 = vld [vmem:[%s3073_s1 + $0x6d8] sm:$0xff] }
  0xd5   :  { %941 = vmatpush.msrb.mxu2 %v344_v12  ;;  %893 = vmatpush.msra.mxu0 %v104_v40  ;;  %v400_v59 = vld [vmem:[%s3073_s1 + $0xb78] sm:$0xff]  ;;  %v1363_v12 = vld [vmem:[%s3074_s0 + $0x8] sm:$0xff]  ;;  %v457_v40 = vadd.f32 %v456_v34, %v427_v31 }
  0xd6   :  { %923 = vmatpush.msra.mxu3 %v272_v41  ;;  %903 = vmatpush.msrb.mxu1 %v208_v42  ;;  %v316_v60 = vld [vmem:[%s3073_s1 + $0x8d8] sm:$0xff]  ;;  %v476_v41 = vpop.f32.mrf.mxu1  ;;  %v516_v42 = vpop.f32.mrf.mxu3 }
  0xd7   :  { %942 = vmatpush.msrb.mxu2 %v340_v61  ;;  %894 = vmatpush.msra.mxu0 %v100_v43  ;;  %v188_v62 = vld [vmem:[%s3073_s1 + $0x4d8] sm:$0xff]  ;;  %v1027_v61 = vld [vmem:[%s3076_s3 + $0xc0] sm:$0xff]  ;;  %v1364_v43 = vld [vmem:[%s3074_s0 + $0x10] sm:$0xff] }
  0xd8   :  { %924 = vmatpush.msra.mxu3 %v268_v44  ;;  %904 = vmatpush.msrb.mxu1 %v204_v46  ;;  %v248_v63 = vld [vmem:[%s3073_s1 + $0x6b8] sm:$0xff] }
  0xd9   :  { %943 = vmatpush.msrb.mxu2 %v336_v7  ;;  %959 = vmatpush.msrb.mxu0 %v416_v45  ;;  %v396_v0 = vld [vmem:[%s3073_s1 + $0xb58] sm:$0xff]  ;;  %v1025_v45 = vld [vmem:[%s3076_s3 + $0xb0] sm:$0xff] }
  0xda   :  { %925 = vmatpush.msra.mxu3 %v264_v47  ;;  %905 = vmatpush.msrb.mxu1 %v200_v50  ;;  %v312_v1 = vld [vmem:[%s3073_s1 + $0x8b8] sm:$0xff]  ;;  %v477_v47 = vadd.f32 %v476_v41, %v457_v40  ;;  %v1063_v50 = vld [vmem:[%s3076_s3 + $0x1e0] sm:$0xff]  ;;  %v1037_v40 = vld [vmem:[%s3076_s3 + $0x110] sm:$0xff] }
  0xdb   :  { %944 = vmatpush.msrb.mxu2 %v332_v8  ;;  %960 = vmatpush.msrb.mxu0 %v412_v48  ;;  %v184_v4 = vld [vmem:[%s3073_s1 + $0x4b8] sm:$0xff]  ;;  %v1065_v8 = vld [vmem:[%s3076_s3 + $0x1f0] sm:$0xff]  ;;  %v1023_v48 = vld [vmem:[%s3076_s3 + $0xa0] sm:$0xff] }
  0xdc   :  { %926 = vmatpush.msra.mxu3 %v260_v51  ;;  %906 = vmatpush.msrb.mxu1 %v196_v3  ;;  %v244_v5 = vld [vmem:[%s3073_s1 + $0x698] sm:$0xff]  ;;  %v1021_v51 = vld [vmem:[%s3076_s3 + $0x90] sm:$0xff] }
  0xdd   :  { %945 = vmatpush.msrb.mxu2 %v328_v49  ;;  %961 = vmatpush.msrb.mxu0 %v408_v52  ;;  %v392_v6 = vld [vmem:[%s3073_s1 + $0xb38] sm:$0xff]  ;;  %v496_v49 = vpop.f32.mrf.mxu2  ;;  %v1365_v52 = vld [vmem:[%s3074_s0 + $0x28] sm:$0xff] }
  0xde   :  { %927 = vmatpush.msra.mxu3 %v256_v54  ;;  %907 = vmatpush.msrb.mxu1 %v192_v57  ;;  %v308_v10 = vld [vmem:[%s3073_s1 + $0x898] sm:$0xff]  ;;  %v497_v3 = vadd.f32 %v496_v49, %v477_v47  ;;  %v1019_v54 = vld [vmem:[%s3076_s3 + $0x80] sm:$0xff]  ;;  %v1096_v49 = vld [vmem:[%s3076_s3 + $0x2e8] sm:$0xff] }
  0xdf   :  { %946 = vmatpush.msrb.mxu2 %v324_v53  ;;  %962 = vmatpush.msrb.mxu0 %v404_v55  ;;  %v180_v11 = vld [vmem:[%s3073_s1 + $0x498] sm:$0xff]  ;;  %v1061_v53 = vld [vmem:[%s3076_s3 + $0x1d0] sm:$0xff]  ;;  %v576_v55 = vpop.f32.mrf.mxu3  ;;  %v1059_v57 = vld [vmem:[%s3076_s3 + $0x1c0] sm:$0xff] }
  0xe0   :  { %928 = vmatpush.msra.mxu3 %v252_v58  ;;  %908 = vmatpush.msrb.mxu1 %v188_v62  ;;  %v240_v13 = vld [vmem:[%s3073_s1 + $0x678] sm:$0xff]  ;;  %v1017_v58 = vld [vmem:[%s3076_s3 + $0x70] sm:$0xff]  ;;  %v517_v62 = vadd.f32 %v516_v42, %v497_v3  ;;  %v1035_v42 = vld [vmem:[%s3076_s3 + $0x100] sm:$0xff] }
  0xe1   :  { %947 = vmatpush.msrb.mxu2 %v320_v56  ;;  %963 = vmatpush.msrb.mxu0 %v400_v59  ;;  %v388_v14 = vld [vmem:[%s3073_s1 + $0xb18] sm:$0xff]  ;;  %v1366_v56 = vld [vmem:[%s3074_s0 + $0x30] sm:$0xff]  ;;  %v1091_v3 = vld [vmem:[%s3076_s3 + $0x2c0] sm:$0xff] }
  0xe2   :  { %929 = vmatpush.msra.mxu3 %v248_v63  ;;  %909 = vmatpush.msrb.mxu1 %v184_v4  ;;  %v176_v15 = vld [vmem:[%s3073_s1 + $0x478] sm:$0xff]  ;;  %v536_v59 = vpop.f32.mrf.mxu0  ;;  %v1015_v63 = vld [vmem:[%s3076_s3 + $0x60] sm:$0xff]  ;;  %v1013_v4 = vld [vmem:[%s3076_s3 + $0x50] sm:$0xff] }
  0xe3   :  { %948 = vmatpush.msrb.mxu2 %v316_v60  ;;  %964 = vmatpush.msrb.mxu0 %v396_v0  ;;  %v236_v16 = vld [vmem:[%s3073_s1 + $0x658] sm:$0xff]  ;;  %v1057_v60 = vld [vmem:[%s3076_s3 + $0x1b0] sm:$0xff]  ;;  %v1055_v0 = vld [vmem:[%s3076_s3 + $0x1a0] sm:$0xff] }
  0xe4   :  { %930 = vmatpush.msra.mxu3 %v244_v5  ;;  %910 = vmatpush.msrb.mxu1 %v180_v11  ;;  %v304_v17 = vld [vmem:[%s3073_s1 + $0x878] sm:$0xff]  ;;  %v428_v5 = vperm.slane %v2618_v27, 1  ;;  %v1011_v11 = vld [vmem:[%s3076_s3 + $0x40] sm:$0xff] }
  0xe5   :  { %949 = vmatpush.msrb.mxu2 %v312_v1  ;;  %965 = vmatpush.msrb.mxu0 %v392_v6  ;;  %v384_v18 = vld [vmem:[%s3073_s1 + $0xaf8] sm:$0xff]  ;;  %v537_v1 = vadd.f32 %v536_v59, %v517_v62  ;;  %v556_v6 = vpop.f32.mrf.mxu1  ;;  %v1087_v59 = vld [vmem:[%s3076_s3 + $0x2a0] sm:$0xff]  ;;  %v1044_v62 = vld [vmem:[%s3076_s3 + $0x148] sm:$0xff] }
  0xe6   :  { %931 = vmatpush.msra.mxu3 %v240_v13  ;;  %v172_v19 = vld [vmem:[%s3073_s1 + $0x458] sm:$0xff]  ;;  %875 = vmatmul.f32.vlgmr.msra.gmra.mxu2 %v1360_v20 }
  0xe7   :  { %950 = vmatpush.msrb.mxu2 %v308_v10  ;;  %966 = vmatpush.msrb.mxu0 %v388_v14  ;;  %v232_v21 = vld [vmem:[%s3073_s1 + $0x638] sm:$0xff]  ;;  %v1053_v10 = vld [vmem:[%s3076_s3 + $0x190] sm:$0xff]  ;;  %v1051_v14 = vld [vmem:[%s3076_s3 + $0x180] sm:$0xff] }
  0xe8   :  { %911 = vmatpush.msrb.mxu1 %v176_v15  ;;  %v300_v22 = vld [vmem:[%s3073_s1 + $0x858] sm:$0xff]  ;;  %932 = vmatpush.msra.mxu3 %v236_v16  ;;  %v557_v15 = vadd.f32 %v556_v6, %v537_v1  ;;  %v1009_v16 = vld [vmem:[%s3076_s3 + $0x30] sm:$0xff]  ;;  %v1040_v6 = vld [vmem:[%s3076_s3 + $0x128] sm:$0xff] }
  0xe9   :  { %951 = vmatpush.msrb.mxu2 %v304_v17  ;;  %v380_v23 = vld [vmem:[%s3073_s1 + $0xad8] sm:$0xff]  ;;  %967 = vmatpush.msrb.mxu0 %v384_v18  ;;  %v1049_v18 = vld [vmem:[%s3076_s3 + $0x170] sm:$0xff] }
  0xea   :  { %v168_v24 = vld [vmem:[%s3073_s1 + $0x438] sm:$0xff]  ;;  %912 = vmatpush.msrb.mxu1 %v172_v19  ;;  %933 = vmatpush.msra.mxu3 %v232_v21  ;;  %v1007_v19 = vld [vmem:[%s3076_s3 + $0x20] sm:$0xff] }
  0xeb   :  { %v228_v25 = vld [vmem:[%s3073_s1 + $0x618] sm:$0xff]  ;;  %952 = vmatpush.msrb.mxu2 %v300_v22  ;;  %968 = vmatpush.msrb.mxu0 %v380_v23  ;;  %v1047_v22 = vld [vmem:[%s3076_s3 + $0x160] sm:$0xff]  ;;  %v2743_v23 = vadd.f32 %v576_v55, %v557_v15  ;;  %v1048_v55 = vld [vmem:[%s3076_s3 + $0x168] sm:$0xff] }
  0xec   :  { %v296_v26 = vld [vmem:[%s3073_s1 + $0x838] sm:$0xff]  ;;  %913 = vmatpush.msrb.mxu1 %v168_v24  ;;  %934 = vmatpush.msra.mxu3 %v228_v25  ;;  %v1005_v24 = vld [vmem:[%s3076_s3 + $0x10] sm:$0xff]  ;;  %v1080_v15 = vld [vmem:[%s3076_s3 + $0x268] sm:$0xff] }
  0xed   :  { %v376_v28 = vld [vmem:[%s3073_s1 + $0xab8] sm:$0xff]  ;;  %953 = vmatpush.msrb.mxu2 %v296_v26  ;;  %895 = vmatmul.f32.vlgmr.msra.gmra.mxu0 %v1363_v12  ;;  %v1045_v26 = vld [vmem:[%s3076_s3 + $0x150] sm:$0xff]  ;;  %v1039_v12 = vld [vmem:[%s3076_s3 + $0x120] sm:$0xff] }
  0xee   :  { %v292_v2 = vld [vmem:[%s3073_s1 + $0x818] sm:$0xff]  ;;  %969 = vmatpush.msrb.mxu0 %v376_v28  ;;  %1112 = vmatpush.msrb.mxu3 %v1033_v29  ;;  %v1003_v28 = vld [vmem:[%s3076_s3] sm:$0xff] }
  0xef   :  { %v372_v30 = vld [vmem:[%s3073_s1 + $0xa98] sm:$0xff]  ;;  %954 = vmatpush.msrb.mxu2 %v292_v2  ;;  %v1043_v2 = vld [vmem:[%s3076_s3 + $0x140] sm:$0xff] }
  0xf0   :  { %v1361_v32 = vld [vmem:[%s3074_s0 + $0x18] sm:$0xff]  ;;  %970 = vmatpush.msrb.mxu0 %v372_v30  ;;  %955 = vmatmul.f32.vlgmr.msrb.gmra.mxu2 %v1362_v36  ;;  %v999_v30 = vmax.f32 %v2743_v23, 0.0 }
  0xf1   :  { %935 = vmatmul.f32.vlgmr.msra.gmra.mxu3 %v1361_v32  ;;  %v164_v35 = vld [vmem:[%s3073_s1 + $0x418] sm:$0xff] }
  0xf2   :  { %v368_v9 = vld [vmem:[%s3073_s1 + $0xa78] sm:$0xff]  ;;  %1113 = vmatpush.msrb.mxu3 %v1031_v33  ;;  %914 = vmatpush.msrb.mxu1 %v164_v35  ;;  %v1041_v35 = vld [vmem:[%s3076_s3 + $0x130] sm:$0xff] }
  0xf3   :  { %v424_v38 = vld [vmem:[%s3073_s1 + $0xc38] sm:$0xff]  ;;  %971 = vmatpush.msrb.mxu0 %v368_v9  ;;  %915 = vmatmul.f32.vlgmr.msrb.gmra.mxu1 %v1364_v43  ;;  %v1064_v9 = vld [vmem:[%s3076_s3 + $0x1e8] sm:$0xff] }
  0xf4   :  { %v364_v39 = vld [vmem:[%s3073_s1 + $0xa58] sm:$0xff]  ;;  %1114 = vmatpush.msrb.mxu3 %v1029_v37  ;;  %993 = vmatpush.msra.mxu1 %v424_v38 }
  0xf5   :  { %v360_v7 = vld [vmem:[%s3073_s1 + $0xa38] sm:$0xff]  ;;  %972 = vmatpush.msrb.mxu0 %v364_v39 }
  0xf6   :  { %v420_v44 = vld [vmem:[%s3073_s1 + $0xc18] sm:$0xff]  ;;  %1115 = vmatpush.msrb.mxu3 %v1027_v61  ;;  %v1060_v61 = vld [vmem:[%s3076_s3 + $0x1c8] sm:$0xff] }
  0xf7   :  { %v356_v46 = vld [vmem:[%s3073_s1 + $0xa18] sm:$0xff]  ;;  %973 = vmatpush.msrb.mxu0 %v360_v7  ;;  %994 = vmatpush.msra.mxu1 %v420_v44  ;;  %v1056_v44 = vld [vmem:[%s3076_s3 + $0x1a8] sm:$0xff] }
  0xf8   :  { %1116 = vmatpush.msrb.mxu3 %v1025_v45  ;;  %v1066_v31 = vld [vmem:[%s3076_s3 + $0x1f8] sm:$0xff] }
  0xf9   :  { %1132 = vmatpush.msrb.mxu1 %v1065_v8  ;;  %974 = vmatpush.msrb.mxu0 %v356_v46  ;;  %v1062_v38 = vld [vmem:[%s3076_s3 + $0x1d8] sm:$0xff]  ;;  %v1097_v46 = vld [vmem:[%s3076_s3 + $0x2f0] sm:$0xff] }
  0xfa   :  { %975 = vmatmul.f32.vlgmr.msrb.gmra.mxu0 %v1365_v52  ;;  %1117 = vmatpush.msrb.mxu3 %v1023_v48  ;;  %v1058_v43 = vld [vmem:[%s3076_s3 + $0x1b8] sm:$0xff]  ;;  %v1095_v48 = vld [vmem:[%s3076_s3 + $0x2e0] sm:$0xff] }
  0xfb   :  { %1133 = vmatpush.msrb.mxu1 %v1063_v50  ;;  %v1054_v8 = vld [vmem:[%s3076_s3 + $0x198] sm:$0xff]  ;;  %1152 = vmatpush.msra.mxu2 %v1097_v46  ;;  %v1052_v50 = vld [vmem:[%s3076_s3 + $0x188] sm:$0xff] }
  0xfc   :  { %1355 = vmatmul.msk.f32.vlgmr.msra.gmra.mxu1 %vm435_vm0, %v1366_v56  ;;  %1118 = vmatpush.msrb.mxu3 %v1021_v51  ;;  %v1098_v47 = vld [vmem:[%s3076_s3 + $0x2f8] sm:$0xff]  ;;  %v1093_v51 = vld [vmem:[%s3076_s3 + $0x2d0] sm:$0xff] }
  0xfd   :  { %1134 = vmatpush.msrb.mxu1 %v1061_v53  ;;  %1153 = vmatpush.msra.mxu2 %v1095_v48  ;;  %v1094_v52 = vld [vmem:[%s3076_s3 + $0x2d8] sm:$0xff]  ;;  %v1089_v56 = vld [vmem:[%s3076_s3 + $0x2b0] sm:$0xff] }
  0xfe   :  { %1119 = vmatpush.msrb.mxu3 %v1019_v54  ;;  %v1050_v53 = vld [vmem:[%s3076_s3 + $0x178] sm:$0xff]  ;;  %v1092_v54 = vld [vmem:[%s3076_s3 + $0x2c8] sm:$0xff] }
  0xff   :  { %1135 = vmatpush.msrb.mxu1 %v1059_v57  ;;  %1154 = vmatpush.msra.mxu2 %v1093_v51  ;;  %v1090_v57 = vld [vmem:[%s3076_s3 + $0x2b8] sm:$0xff] }
 0x100   :  { %1120 = vmatpush.msrb.mxu3 %v1017_v58  ;;  %v1046_v58 = vld [vmem:[%s3076_s3 + $0x158] sm:$0xff] }
 0x101   :  { %1136 = vmatpush.msrb.mxu1 %v1057_v60  ;;  %v596_v13 = vpop.f32.mrf.mxu3  ;;  %1155 = vmatpush.msra.mxu2 %v1091_v3  ;;  %v1088_v60 = vld [vmem:[%s3076_s3 + $0x2a8] sm:$0xff]  ;;  %v1042_v1 = vld [vmem:[%s3076_s3 + $0x138] sm:$0xff] }
 0x102   :  { %1121 = vmatpush.msrb.mxu3 %v1015_v63  ;;  %v597_v17 = vadd.f32 %v596_v13, %v428_v5  ;;  %v1085_v63 = vld [vmem:[%s3076_s3 + $0x290] sm:$0xff]  ;;  %v1084_v5 = vld [vmem:[%s3076_s3 + $0x288] sm:$0xff]  ;;  %v1082_v13 = vld [vmem:[%s3076_s3 + $0x278] sm:$0xff] }
 0x103   :  { %1137 = vmatpush.msrb.mxu1 %v1055_v0  ;;  %v616_v20 = vpop.f32.mrf.mxu2  ;;  %1156 = vmatpush.msra.mxu2 %v1089_v56  ;;  %v1086_v0 = vld [vmem:[%s3076_s3 + $0x298] sm:$0xff]  ;;  %v1100_v56 = vld [vmem:[%s3076_s3 + $0x308] sm:$0xff] }
 0x104   :  { %1122 = vmatpush.msrb.mxu3 %v1013_v4  ;;  %v617_v21 = vadd.f32 %v616_v20, %v597_v17  ;;  %v656_v32 = vpop.f32.mrf.mxu1  ;;  %v1083_v4 = vld [vmem:[%s3076_s3 + $0x280] sm:$0xff]  ;;  %v1077_v17 = vld [vmem:[%s3076_s3 + $0x250] sm:$0xff]  ;;  %v1076_v20 = vld [vmem:[%s3076_s3 + $0x248] sm:$0xff] }
 0x105   :  { %1138 = vmatpush.msrb.mxu1 %v1053_v10  ;;  %1157 = vmatpush.msra.mxu2 %v1087_v59  ;;  %v1038_v10 = vld [vmem:[%s3076_s3 + $0x118] sm:$0xff] }
 0x106   :  { %1123 = vmatpush.msrb.mxu3 %v1011_v11  ;;  %v1081_v11 = vld [vmem:[%s3076_s3 + $0x270] sm:$0xff]  ;;  %v1022_v48 = vld [vmem:[%s3076_s3 + $0x98] sm:$0xff] }
 0x107   :  { %1139 = vmatpush.msrb.mxu1 %v1051_v14  ;;  %1158 = vmatpush.msra.mxu2 %v1085_v63  ;;  %v1079_v14 = vld [vmem:[%s3076_s3 + $0x260] sm:$0xff]  ;;  %v1014_v3 = vld [vmem:[%s3076_s3 + $0x58] sm:$0xff] }
 0x108   :  { %1124 = vmatpush.msrb.mxu3 %v1009_v16  ;;  %v636_v25 = vpop.f32.mrf.mxu0  ;;  %v1036_v16 = vld [vmem:[%s3076_s3 + $0x108] sm:$0xff]  ;;  %v1006_v59 = vld [vmem:[%s3076_s3 + $0x18] sm:$0xff] }
 0x109   :  { %1140 = vmatpush.msrb.mxu1 %v1049_v18  ;;  %v637_v29 = vadd.f32 %v636_v25, %v617_v21  ;;  %1159 = vmatpush.msra.mxu2 %v1083_v4  ;;  %v1078_v18 = vld [vmem:[%s3076_s3 + $0x258] sm:$0xff]  ;;  %v1073_v21 = vld [vmem:[%s3076_s3 + $0x230] sm:$0xff]  ;;  %v1072_v25 = vld [vmem:[%s3076_s3 + $0x228] sm:$0xff] }
 0x10a   :  { %1125 = vmatpush.msrb.mxu3 %v1007_v19  ;;  %v1075_v19 = vld [vmem:[%s3076_s3 + $0x240] sm:$0xff]  ;;  %v1285_v23 = vld [vmem:[%s3078_s5 + $0x58] sm:$0xff] }
 0x10b   :  { %1141 = vmatpush.msrb.mxu1 %v1047_v22  ;;  %v657_v34 = vadd.f32 %v656_v32, %v637_v29  ;;  %1160 = vmatpush.msra.mxu2 %v1081_v11  ;;  %v1074_v22 = vld [vmem:[%s3076_s3 + $0x238] sm:$0xff]  ;;  %v1067_v29 = vld [vmem:[%s3076_s3 + $0x200] sm:$0xff] }
 0x10c   :  { %1126 = vmatpush.msrb.mxu3 %v1005_v24  ;;  %v676_v33 = vpop.f32.mrf.mxu3  ;;  %v1071_v24 = vld [vmem:[%s3076_s3 + $0x220] sm:$0xff] }
 0x10d   :  { %1142 = vmatpush.msrb.mxu1 %v1045_v26  ;;  %v677_v36 = vadd.f32 %v676_v33, %v657_v34  ;;  %1161 = vmatpush.msra.mxu2 %v1079_v14  ;;  %v1069_v26 = vld [vmem:[%s3076_s3 + $0x210] sm:$0xff]  ;;  %v1099_v32 = vld [vmem:[%s3076_s3 + $0x300] sm:$0xff]  ;;  %v1034_v33 = vld [vmem:[%s3076_s3 + $0xf8] sm:$0xff] }
 0x10e   :  { %1127 = vmatpush.msrb.mxu3 %v1003_v28  ;;  %v1070_v28 = vld [vmem:[%s3076_s3 + $0x218] sm:$0xff]  ;;  %v1032_v34 = vld [vmem:[%s3076_s3 + $0xe8] sm:$0xff] }
 0x10f   :  { %1128 = vmatmul.f32.vlgmr.msrb.gmra.mxu3 %v999_v30  ;;  %1143 = vmatpush.msrb.mxu1 %v1043_v2  ;;  %v696_v37 = vpop.f32.mrf.mxu2  ;;  %v1068_v2 = vld [vmem:[%s3076_s3 + $0x208] sm:$0xff] }
 0x110   :  { %1212 = vmatpush.msra.mxu3 %v1066_v31  ;;  %v697_v39 = vadd.f32 %v696_v37, %v677_v36  ;;  %1162 = vmatpush.msra.mxu2 %v1077_v17  ;;  %v1101_v31 = vld [vmem:[%s3076_s3 + $0x310] sm:$0xff] }
 0x111   :  { %1144 = vmatpush.msrb.mxu1 %v1041_v35  ;;  %1186 = vmatpush.msra.mxu0 %v1101_v31  ;;  %v1030_v35 = vld [vmem:[%s3076_s3 + $0xd8] sm:$0xff] }
 0x112   :  { %1213 = vmatpush.msra.mxu3 %v1064_v9  ;;  %v716_v41 = vpop.f32.mrf.mxu0  ;;  %1163 = vmatpush.msra.mxu2 %v1075_v19  ;;  %v429_v9 = vperm.slane %v2618_v27, 2  ;;  %v1277_v31 = vld [vmem:[%s3078_s5 + $0x18] sm:$0xff] }
 0x113   :  { %1145 = vmatpush.msrb.mxu1 %v1039_v12  ;;  %v2787_v7 = vadd.f32 %v716_v41, %v697_v39  ;;  %1187 = vmatpush.msra.mxu0 %v1099_v32  ;;  %v1028_v41 = vld [vmem:[%s3076_s3 + $0xc8] sm:$0xff]  ;;  %v1276_v32 = vld [vmem:[%s3078_s5 + $0x10] sm:$0xff] }
 0x114   :  { %1214 = vmatpush.msra.mxu3 %v1062_v38  ;;  %1164 = vmatpush.msra.mxu2 %v1073_v21  ;;  %v1287_v21 = vld [vmem:[%s3078_s5 + $0x68] sm:$0xff] }
 0x115   :  { %1146 = vmatpush.msrb.mxu1 %v1037_v40  ;;  %v1000_v45 = vmax.f32 %v2787_v7, 0.0  ;;  %1192 = vmatpush.msrb.mxu0 %v1034_v33  ;;  %v1026_v7 = vld [vmem:[%s3076_s3 + $0xb8] sm:$0xff]  ;;  %v1275_v33 = vld [vmem:[%s3078_s5 + $0x8] sm:$0xff] }
 0x116   :  { %1215 = vmatpush.msra.mxu3 %v1060_v61  ;;  %1165 = vmatpush.msra.mxu2 %v1071_v24  ;;  %v1283_v24 = vld [vmem:[%s3078_s5 + $0x48] sm:$0xff] }
 0x117   :  { %1147 = vmatpush.msrb.mxu1 %v1035_v42  ;;  %1193 = vmatpush.msrb.mxu0 %v1032_v34  ;;  %v1298_v34 = vld [vmem:[%s3078_s5 + $0xc0] sm:$0xff] }
 0x118   :  { %1216 = vmatpush.msra.mxu3 %v1058_v43  ;;  %1148 = vmatmul.f32.vlgmr.msrb.gmra.mxu1 %v1000_v45 }
 0x119   :  { %1232 = vmatpush.msra.mxu1 %v1098_v47  ;;  %1166 = vmatpush.msra.mxu2 %v1069_v26  ;;  %v1281_v26 = vld [vmem:[%s3078_s5 + $0x38] sm:$0xff] }
 0x11a   :  { %1217 = vmatpush.msra.mxu3 %v1056_v44  ;;  %1194 = vmatpush.msrb.mxu0 %v1030_v35  ;;  %v1274_v35 = vld [vmem:[%s3078_s5] sm:$0xff] }
 0x11b   :  { %1233 = vmatpush.msra.mxu1 %v1096_v49  ;;  %1167 = vmatpush.msra.mxu2 %v1067_v29  ;;  %v1279_v29 = vld [vmem:[%s3078_s5 + $0x28] sm:$0xff] }
 0x11c   :  { %1218 = vmatpush.msra.mxu3 %v1054_v8  ;;  %1195 = vmatpush.msrb.mxu0 %v1028_v41  ;;  %v1103_v41 = vld [vmem:[%s3079_s4] sm:$0x3] }
 0x11d   :  { %1234 = vmatpush.msra.mxu1 %v1094_v52  ;;  %v1018_v52 = vld [vmem:[%s3076_s3 + $0x78] sm:$0xff] }
 0x11e   :  { %1219 = vmatpush.msra.mxu3 %v1052_v50  ;;  %1196 = vmatpush.msrb.mxu0 %v1026_v7  ;;  %v1020_v50 = vld [vmem:[%s3076_s3 + $0x88] sm:$0xff] }
 0x11f   :  { %1235 = vmatpush.msra.mxu1 %v1092_v54  ;;  %v1102_v54 = vld [vmem:[%s3076_s3 + $0x318] sm:$0xff] }
 0x120   :  { %1220 = vmatpush.msra.mxu3 %v1050_v53  ;;  %v1016_v53 = vld [vmem:[%s3076_s3 + $0x68] sm:$0xff]  ;;  %1266 = vmatpush.msrb.mxu2 %v1102_v54 }
 0x121   :  { %1236 = vmatpush.msra.mxu1 %v1090_v57  ;;  %v1010_v57 = vld [vmem:[%s3076_s3 + $0x38] sm:$0xff] }
 0x122   :  { %1221 = vmatpush.msra.mxu3 %v1048_v55  ;;  %v1012_v55 = vld [vmem:[%s3076_s3 + $0x48] sm:$0xff]  ;;  %1267 = vmatpush.msrb.mxu2 %v1100_v56 }
 0x123   :  { %1237 = vmatpush.msra.mxu1 %v1088_v60  ;;  %v1004_v60 = vld [vmem:[%s3076_s3 + $0x8] sm:$0xff] }
 0x124   :  { %1222 = vmatpush.msra.mxu3 %v1046_v58  ;;  %v1008_v58 = vld [vmem:[%s3076_s3 + $0x28] sm:$0xff] }
 0x125   :  { %1238 = vmatpush.msra.mxu1 %v1086_v0 }
 0x126   :  { %1223 = vmatpush.msra.mxu3 %v1044_v62  ;;  %v430_v62 = vperm.slane %v2618_v27, 3  ;;  %v1289_v27 = vld [vmem:[%s3078_s5 + $0x78] sm:$0xff] }
 0x127   :  { %1239 = vmatpush.msra.mxu1 %v1084_v5 }
 0x128   :  { %1224 = vmatpush.msra.mxu3 %v1042_v1 }
 0x129   :  { %1240 = vmatpush.msra.mxu1 %v1082_v13 }
 0x12a   :  { %1225 = vmatpush.msra.mxu3 %v1040_v6 }
 0x12b   :  { %1241 = vmatpush.msra.mxu1 %v1080_v15 }
 0x12c   :  { %1226 = vmatpush.msra.mxu3 %v1038_v10 }
 0x12d   :  { %1242 = vmatpush.msra.mxu1 %v1078_v18 }
 0x12e   :  { %1227 = vmatpush.msra.mxu3 %v1036_v16  ;;  %v736_v36 = vpop.f32.mrf.mxu1 }
 0x12f   :  { %1228 = vmatmul.f32.vlgmr.msra.gmra.mxu3 %v1000_v45  ;;  %1243 = vmatpush.msra.mxu1 %v1076_v20  ;;  %v737_v37 = vadd.f32 %v736_v36, %v429_v9  ;;  %v756_v12 = vpop.f32.mrf.mxu3  ;;  %v1024_v45 = vld [vmem:[%s3076_s3 + $0xa8] sm:$0xff]  ;;  %v1288_v20 = vld [vmem:[%s3078_s5 + $0x70] sm:$0xff]  ;;  %v1297_v9 = vld [vmem:[%s3078_s5 + $0xb8] sm:$0xff] }
 0x130   :  { %1197 = vmatpush.msrb.mxu0 %v1024_v45  ;;  %v1296_v36 = vld [vmem:[%s3078_s5 + $0xb0] sm:$0xff] }
 0x131   :  { %1244 = vmatpush.msra.mxu1 %v1074_v22  ;;  %v757_v38 = vadd.f32 %v756_v12, %v737_v37  ;;  %v1286_v22 = vld [vmem:[%s3078_s5 + $0x60] sm:$0xff]  ;;  %v1295_v37 = vld [vmem:[%s3078_s5 + $0xa8] sm:$0xff] }
 0x132   :  { %1198 = vmatpush.msrb.mxu0 %v1022_v48  ;;  %v1294_v12 = vld [vmem:[%s3078_s5 + $0xa0] sm:$0xff] }
 0x133   :  { %1245 = vmatpush.msra.mxu1 %v1072_v25  ;;  %v1282_v25 = vld [vmem:[%s3078_s5 + $0x40] sm:$0xff] }
 0x134   :  { %v776_v39 = vpop.f32.mrf.mxu0  ;;  %1199 = vmatpush.msrb.mxu0 %v1020_v50  ;;  %v1106_v50 = vperm.slane %v1103_v41, 1 }
 0x135   :  { %1246 = vmatpush.msra.mxu1 %v1070_v28  ;;  %v777_v40 = vadd.f32 %v776_v39, %v757_v38  ;;  %v796_v61 = vpop.f32.mrf.mxu2  ;;  %v1280_v28 = vld [vmem:[%s3078_s5 + $0x30] sm:$0xff]  ;;  %v1293_v38 = vld [vmem:[%s3078_s5 + $0x98] sm:$0xff] }
 0x136   :  { %1200 = vmatpush.msrb.mxu0 %v1018_v52  ;;  %v1292_v39 = vld [vmem:[%s3078_s5 + $0x90] sm:$0xff] }
 0x137   :  { %1247 = vmatpush.msra.mxu1 %v1068_v2  ;;  %v797_v43 = vadd.f32 %v796_v61, %v777_v40  ;;  %v1278_v2 = vld [vmem:[%s3078_s5 + $0x20] sm:$0xff]  ;;  %v1291_v40 = vld [vmem:[%s3078_s5 + $0x88] sm:$0xff] }
 0x138   :  { %1201 = vmatpush.msrb.mxu0 %v1016_v53  ;;  %v1290_v61 = vld [vmem:[%s3078_s5 + $0x80] sm:$0xff] }
 0x13a   :  { %1202 = vmatpush.msrb.mxu0 %v1014_v3 }
 0x13c   :  { %1203 = vmatpush.msrb.mxu0 %v1012_v55 }
 0x13e   :  { %1204 = vmatpush.msrb.mxu0 %v1010_v57 }
 0x140   :  { %1205 = vmatpush.msrb.mxu0 %v1008_v58 }
 0x142   :  { %1206 = vmatpush.msrb.mxu0 %v1006_v59  ;;  %v1359_v59 = vld [vmem:[%s3077_s6] ss:$0 sm:$0xff] }
 0x144   :  { %1207 = vmatpush.msrb.mxu0 %v1004_v60 }
 0x147   :  { %v816_v42 = vpop.f32.mrf.mxu1 }
 0x148   :  { %v817_v44 = vadd.f32 %v816_v42, %v797_v43  ;;  %v1105_v42 = vperm.slane %v1103_v41, 0 }
 0x14d   :  { %v856_v46 = vpop.f32.mrf.mxu0 }
 0x150   :  { %v836_v8 = vpop.f32.mrf.mxu3 }
 0x151   :  { %v837_v47 = vadd.f32 %v836_v8, %v817_v44 }
 0x153   :  { %v857_v49 = vadd.f32 %v856_v46, %v837_v47 }
 0x155   :  { %v1001_v51 = vmax.f32 %v857_v49, 0.0 }
 0x157   :  { %1168 = vmatmul.f32.vlgmr.msra.gmra.mxu2 %v1001_v51  ;;  %1248 = vmatmul.f32.vlgmr.msra.gmra.mxu1 %v1001_v51 }
 0x158   :  { %1307 = vmatpush.msra.mxu2 %v1289_v27 }
 0x15a   :  { %1308 = vmatpush.msra.mxu2 %v1288_v20 }
 0x15c   :  { %1309 = vmatpush.msra.mxu2 %v1287_v21 }
 0x15e   :  { %1310 = vmatpush.msra.mxu2 %v1286_v22 }
 0x160   :  { %1311 = vmatpush.msra.mxu2 %v1285_v23 }
 0x169   :  { %v876_v63 = vpop.f32.mrf.mxu2 }
 0x16a   :  { %v877_v0 = vadd.f32 %v876_v63, %v430_v62  ;;  %v896_v1 = vpop.f32.mrf.mxu0 }
 0x16c   :  { %v897_v4 = vadd.f32 %v896_v1, %v877_v0 }
 0x170   :  { %v916_v5 = vpop.f32.mrf.mxu1 }
 0x171   :  { %v917_v6 = vadd.f32 %v916_v5, %v897_v4 }
 0x173   :  { %v956_v13 = vpop.f32.mrf.mxu2 }
 0x174   :  { %v936_v10 = vpop.f32.mrf.mxu3 }
 0x175   :  { %v937_v11 = vadd.f32 %v936_v10, %v917_v6 }
 0x177   :  { %v957_v14 = vadd.f32 %v956_v13, %v937_v11  ;;  %v976_v15 = vpop.f32.mrf.mxu0 }
 0x179   :  { %v977_v16 = vadd.f32 %v976_v15, %v957_v14  ;;  %v996_v17 = vpop.f32.mrf.mxu1 }
 0x17b   :  { %v997_v18 = vadd.f32 %v996_v17, %v977_v16 }
 0x17d   :  { %v1002_v19 = vmax.f32 %v997_v18, 0.0 }
 0x17f   :  { %1356 = vmatmul.msk.f32.vlgmr.msra.gmra.mxu0 %vm435_vm0, %v1002_v19  ;;  %1357 = vmatmul.msk.f32.vlgmr.msrb.gmra.mxu2 %vm435_vm0, %v1002_v19 }
 0x180   :  { %1334 = vmatpush.msra.mxu0 %v1298_v34 }
 0x182   :  { %1335 = vmatpush.msra.mxu0 %v1297_v9 }
 0x184   :  { %1336 = vmatpush.msra.mxu0 %v1296_v36 }
 0x186   :  { %1337 = vmatpush.msra.mxu0 %v1295_v37 }
 0x187   :  { %1208 = vmatmul.f32.vlgmr.msrb.gmra.mxu0 %v999_v30  ;;  %v1284_v30 = vld [vmem:[%s3078_s5 + $0x50] sm:$0xff] }
 0x188   :  { %1312 = vmatpush.msra.mxu2 %v1284_v30  ;;  %1338 = vmatpush.msra.mxu0 %v1294_v12 }
 0x18a   :  { %1313 = vmatpush.msra.mxu2 %v1283_v24  ;;  %1339 = vmatpush.msra.mxu0 %v1293_v38 }
 0x18c   :  { %1314 = vmatpush.msra.mxu2 %v1282_v25  ;;  %1340 = vmatpush.msra.mxu0 %v1292_v39 }
 0x18e   :  { %1315 = vmatpush.msra.mxu2 %v1281_v26  ;;  %1341 = vmatpush.msra.mxu0 %v1291_v40 }
 0x190   :  { %1316 = vmatpush.msra.mxu2 %v1280_v28  ;;  %1342 = vmatpush.msra.mxu0 %v1290_v61 }
 0x192   :  { %1317 = vmatpush.msra.mxu2 %v1279_v29  ;;  %v1129_v43 = vpop.f32.mrf.mxu3 }
 0x193   :  { %v1130_v44 = vadd.f32 %v1129_v43, %v1105_v42 }
 0x194   :  { %1318 = vmatpush.msra.mxu2 %v1278_v2 }
 0x195   :  { %v1149_v7 = vpop.f32.mrf.mxu1 }
 0x196   :  { %1319 = vmatpush.msra.mxu2 %v1277_v31  ;;  %v1150_v8 = vadd.f32 %v1149_v7, %v1130_v44 }
 0x198   :  { %1320 = vmatpush.msra.mxu2 %v1276_v32 }
 0x19a   :  { %1321 = vmatpush.msra.mxu2 %v1275_v33 }
 0x19c   :  { %1322 = vmatpush.msra.mxu2 %v1274_v35 }
 0x1b2   :  { %v1229_v53 = vpop.f32.mrf.mxu3 }
 0x1d4   :  { %v1249_v54 = vpop.f32.mrf.mxu1 }
 0x1da   :  { %v1169_v45 = vpop.f32.mrf.mxu2 }
 0x1db   :  { %v1170_v46 = vadd.f32 %v1169_v45, %v1150_v8 }
 0x1fc   :  { %v1189_v47 = vpop.f32.mrf.mxu0 }
 0x1fd   :  { %v1190_v48 = vadd.f32 %v1189_v47, %v1170_v46 }
 0x1ff   :  { %v1272_v49 = vmax.f32 %v1190_v48, 0.0 }
 0x201   :  { %1323 = vmatmul.f32.vlgmr.msra.gmra.mxu2 %v1272_v49 }
 0x202   :  { %v1269_v56 = vpop.f32.mrf.mxu2 }
 0x204   :  { %v1209_v51 = vpop.f32.mrf.mxu0 }
 0x205   :  { %v1210_v52 = vadd.f32 %v1209_v51, %v1106_v50 }
 0x207   :  { %v1230_v3 = vadd.f32 %v1229_v53, %v1210_v52 }
 0x209   :  { %v1250_v55 = vadd.f32 %v1249_v54, %v1230_v3 }
 0x20b   :  { %v1270_v57 = vadd.f32 %v1269_v56, %v1250_v55 }
 0x20d   :  { %v1273_v58 = vmax.f32 %v1270_v57, 0.0 }
 0x20f   :  { %1358 = vmatmul.msk.f32.vlgmr.msra.gmra.mxu0 %vm1303_vm1, %v1273_v58 }
 0x284   :  { %v1324_v60 = vpop.f32.mrf.mxu2 }
 0x285   :  { %v1325_v62 = vadd.f32 %v1359_v59, %v1324_v60 }
 0x28c   :  { %v1344_v63 = vpop.f32.mrf.mxu0 }
 0x28d   :  { %v1345_v0 = vadd.f32 %v1344_v63, %v1325_v62 }
 0x28f   :  { %1347 = vst [vmem:[%s3080_s7] sm:$0xff] %v1345_v0 }

</bundles_post_ra>
